<compile_context>
chip_gen: v7x
topology: tpu7x:2x2x1
jax: 0.10.0
libtpu: 0.0.40
codegen_flags: <defaults>
</compile_context>

<pallas_src>
import math
import functools

import jax
import jax.numpy as jnp
from jax import lax
from jax.experimental import pallas as pl
from jax.experimental.pallas import tpu as pltpu

NEG_INF = -1e30  # additive key-padding mask value (at least one key is always valid)


# ----------------------------------------------------------------------------
# shared math helpers (pure jnp; usable inside the kernel and in the reference)
# ----------------------------------------------------------------------------
def _layer_norm(x, g, b, eps=1e-5):
    mu = jnp.mean(x, axis=-1, keepdims=True)
    var = jnp.mean(jnp.square(x - mu), axis=-1, keepdims=True)
    return (x - mu) * lax.rsqrt(var + eps) * g + b


def _mm(x, w, cd=jnp.float32):
    """x @ w.T via dot_general contracting last dims (no XLU transpose); f32 acc."""
    return lax.dot_general(x.astype(cd), w.astype(cd), (((1,), (1,)), ((), ())),
                           preferred_element_type=jnp.float32)


# ----------------------------------------------------------------------------
# kernel-only helpers
# ----------------------------------------------------------------------------
def _softmax_lastdim(s):
    """Numerically-safe softmax; division moved to the EUP via pl.reciprocal."""
    s = s - jnp.max(s, axis=-1, keepdims=True)
    p = jnp.exp(s)
    return p * pl.reciprocal(jnp.sum(p, axis=-1, keepdims=True), approx=True)


def _attn(q2, k2, v2, out_w, out_b, mask3, Nb, T, nhead, cd):
    """Multi-head attention on batch-folded (Nb*T, D) q/k/v (q is pre-scaled).

    Per-head scores/softmax/value use batched einsums over the batch dim; head
    outputs are lane-concatenated once and projected with a single K=D matmul
    (instead of nhead tiny K=head_dim partial projections).
    """
    D = out_w.shape[0]
    hd = D // nhead
    q3 = q2.reshape(Nb, T, D)
    k3 = k2.reshape(Nb, T, D)
    v3 = v2.reshape(Nb, T, D)
    heads = []
    for h in range(nhead):                                   # static unroll (nhead small)
        sl = slice(h * hd, (h + 1) * hd)
        s = jnp.einsum('bqd,bkd->bqk', q3[:, :, sl].astype(cd), k3[:, :, sl].astype(cd),
                       preferred_element_type=jnp.float32) + mask3      # (Nb, T, T)
        p = _softmax_lastdim(s)
        heads.append(jnp.einsum('bqk,bkd->bqd', p.astype(cd), v3[:, :, sl].astype(cd),
                                preferred_element_type=jnp.float32))    # (Nb, T, hd)
    o = jnp.concatenate(heads, axis=-1).reshape(Nb * T, D)   # one lane regroup
    return _mm(o, out_w, cd) + out_b                         # single K=D out-proj


# ----------------------------------------------------------------------------
# fused, layer-streamed forward kernel (grid = (batch_blocks, num_layers))
# ----------------------------------------------------------------------------
def _fused_forward_kernel(tokens_ref, mask_ref, pe_ref,
                          proj_w_ref, cls_w_ref, cls_b_ref,
                          sa_w_ref, sa_b_ref, sa_ow_ref, sa_ob_ref,
                          ca_w_ref, ca_b_ref, ca_ow_ref, ca_ob_ref,
                          ff_w1_ref, ff_b1_ref, ff_w2_ref, ff_b2_ref,
                          ln_g_ref, ln_b_ref,
                          out_ref, logits_ref,
                          x_scr, mem_scr,
                          *, Nb, T, nhead, softmax_tokens, compute_dtype):
    D = pe_ref.shape[1]
    cd = compute_dtype
    l = pl.program_id(1)
    last = pl.num_programs(1) - 1
    mask3 = mask_ref[...]                      # (Nb, 1, T) additive key-padding mask

    # --- first layer of each batch block: build decoder query + memory once ---
    @pl.when(l == 0)
    def _init():
        tok = tokens_ref[...].reshape(Nb * T, -1)
        if softmax_tokens:                     # PretrainLan: tokens = softmax(logits, -1)
            tok = _softmax_lastdim(tok)
        pe = pe_ref[...]                       # (T, D): PE tiled over batch in-kernel
        pe2 = pe if Nb == 1 else jnp.concatenate([pe] * Nb, axis=0)
        mem_scr[...] = _mm(tok, proj_w_ref[...], cd) + pe2   # proj + token_encoder PE
        x_scr[...] = pe2                       # pos_encoder(zeros) == PE broadcast

    x = x_scr[...]                             # (Nb*T, D) decoder state (layer carry)
    mem = mem_scr[...]                         # (Nb*T, D) encoder memory
    ln_g = ln_g_ref[0]                         # (3, D)
    ln_b = ln_b_ref[0]

    # --- self-attention + residual + LN1 (post-norm; eval dropout = identity) ---
    w = sa_w_ref[0]                            # (3D, D); sublane-aligned row slices
    b = sa_b_ref[0]                            # (3, D)
    q = _mm(x, w[:D], cd) + b[0:1]             # 1/sqrt(hd) folded into W_q host-side
    k = _mm(x, w[D:2 * D], cd) + b[1:2]
    v = _mm(x, w[2 * D:], cd) + b[2:3]
    sa = _attn(q, k, v, sa_ow_ref[0], sa_ob_ref[0], mask3, Nb, T, nhead, cd)
    x = _layer_norm(x + sa, ln_g[0:1], ln_b[0:1])

    # --- cross-attention over memory + residual + LN2 ---
    w = ca_w_ref[0]
    b = ca_b_ref[0]
    q = _mm(x, w[:D], cd) + b[0:1]
    k = _mm(mem, w[D:2 * D], cd) + b[1:2]
    v = _mm(mem, w[2 * D:], cd) + b[2:3]
    ca = _attn(q, k, v, ca_ow_ref[0], ca_ob_ref[0], mask3, Nb, T, nhead, cd)
    x = _layer_norm(x + ca, ln_g[1:2], ln_b[1:2])

    # --- feed-forward (relu) + residual + LN3 ---
    h = jnp.maximum(_mm(x, ff_w1_ref[0], cd) + ff_b1_ref[0], 0.0)       # (Nb*T, F)
    ff = _mm(h, ff_w2_ref[0], cd) + ff_b2_ref[0]                        # (Nb*T, D)
    x = _layer_norm(x + ff, ln_g[2:3], ln_b[2:3])

    x_scr[...] = x                             # carry to the next layer grid step

    # --- last layer: feature output + classification head ---
    @pl.when(l == last)
    def _fin():
        out_ref[...] = x.reshape(Nb, T, D).astype(out_ref.dtype)
        logits = _mm(x, cls_w_ref[...], cd) + cls_b_ref[...]
        logits_ref[...] = logits.reshape(Nb, T, -1).astype(logits_ref.dtype)


# ----------------------------------------------------------------------------
# host-side glue
# ----------------------------------------------------------------------------
def positional_encoding(max_len, d_model):
    pos = jnp.arange(max_len, dtype=jnp.float32)[:, None]
    div = jnp.exp(jnp.arange(0, d_model, 2, dtype=jnp.float32)
                  * (-math.log(10000.0) / d_model))
    pe = jnp.zeros((max_len, d_model), jnp.float32)
    pe = pe.at[:, 0::2].set(jnp.sin(pos * div))
    pe = pe.at[:, 1::2].set(jnp.cos(pos * div))
    return pe


def padding_mask_additive(lengths, max_length):
    grid = jnp.arange(max_length)[None, :]
    pad = grid >= lengths[:, None]                                       # (N, T) bool
    return jnp.where(pad, NEG_INF, 0.0).astype(jnp.float32)[:, None, :]  # (N, 1, T)


def _padded_bytes(shape, itemsize=4):
    """Bytes of one VMEM block padded to (8 sublane, 128 lane) tiles."""
    s = list(shape)
    s[-1] = -(-s[-1] // 128) * 128
    if len(s) >= 2:
        s[-2] = -(-s[-2] // 8) * 8
    n = 1
    for v in s:
        n *= v
    return n * itemsize


def _derive_vmem_limit(Nb, T, C, D, F, w_itemsize):
    """Streamed-footprint budget: resident blocks + 2 layers of weights + scratch."""
    resident = sum(_padded_bytes(s) for s in
                   [(Nb, T, C), (Nb, 1, T), (T, D), (D, C), (C, D), (1, C)])
    per_layer = (sum(_padded_bytes(s, w_itemsize) for s in
                     [(3 * D, D), (D, D), (3 * D, D), (D, D), (F, D), (D, F)])
                 + sum(_padded_bytes(s) for s in
                       [(3, D), (1, D), (3, D), (1, D), (1, F), (1, D), (3, D), (3, D)]))
    outputs = _padded_bytes((Nb, T, D)) + _padded_bytes((Nb, T, C))
    scratch = 2 * _padded_bytes((Nb * T, D))
    total = 2 * resident + 2 * per_layer + 2 * outputs + scratch   # x2 = double buffers
    # 2x headroom for compiler temporaries; floor 16 MiB, cap below v7x's 64 MiB.
    return int(min(max(2 * total + (8 << 20), 16 << 20), 60 << 20))


def permuted_language_forward(tokens, lengths, params, config, *,
                              softmax_tokens=False, batch_block=1, use_bf16=False):
    """tokens: (N, T, C), lengths: (N,). Returns (out (N,T,D), logits (N,T,C))."""
    N, T, C = tokens.shape
    D = config['d_model']
    F = config['d_inner']
    L = config['num_layers']
    nhead = config['nhead']
    assert N % batch_block == 0 and D % nhead == 0
    Nb = batch_block

    cd = jnp.bfloat16 if use_bf16 else jnp.float32   # matmul compute dtype
    wd = cd                                          # matmul-weight storage dtype

    pe = positional_encoding(T, D)                   # (T, D): passed once, tiled in-kernel
    mask_add = padding_mask_additive(lengths, T)     # (N, 1, T)

    # fold the 1/sqrt(head_dim) attention scale into the Q rows (zero-cost host xform)
    scale = 1.0 / math.sqrt(D // nhead)
    sa_in_w = params['sa_in_w'].at[:, :D, :].multiply(scale).astype(wd)
    ca_in_w = params['ca_in_w'].at[:, :D, :].multiply(scale).astype(wd)
    sa_in_b = params['sa_in_b'].at[:, 0:1, :].multiply(scale)
    ca_in_b = params['ca_in_b'].at[:, 0:1, :].multiply(scale)

    kernel = functools.partial(_fused_forward_kernel, Nb=Nb, T=T, nhead=nhead,
                               softmax_tokens=softmax_tokens, compute_dtype=cd)

    b_map = lambda b, l: (b, 0, 0)      # per-batch-block, resident across the layer axis
    l_map = lambda b, l: (l, 0, 0)      # streamed per layer (auto double-buffered DMA)
    fix2 = lambda b, l: (0, 0)          # fully resident

    grid_spec = pltpu.PrefetchScalarGridSpec(
        num_scalar_prefetch=0,
        grid=(N // Nb, L),
        in_specs=[
            pl.BlockSpec((Nb, T, C), b_map),        # tokens
            pl.BlockSpec((Nb, 1, T), b_map),        # additive key-padding mask
            pl.BlockSpec((T, D), fix2),             # positional encoding
            pl.BlockSpec((D, C), fix2),             # proj weight (no bias)
            pl.BlockSpec((C, D), fix2),             # cls weight
            pl.BlockSpec((1, C), fix2),             # cls bias
            pl.BlockSpec((1, 3 * D, D), l_map),     # self-attn in-proj W
            pl.BlockSpec((1, 3, D), l_map),         # self-attn in-proj b (q,k,v rows)
            pl.BlockSpec((1, D, D), l_map),         # self-attn out-proj W
            pl.BlockSpec((1, 1, D), l_map),         # self-attn out-proj b
            pl.BlockSpec((1, 3 * D, D), l_map),     # cross-attn in-proj W
            pl.BlockSpec((1, 3, D), l_map),         # cross-attn in-proj b
            pl.BlockSpec((1, D, D), l_map),         # cross-attn out-proj W
            pl.BlockSpec((1, 1, D), l_map),         # cross-attn out-proj b
            pl.BlockSpec((1, F, D), l_map),         # ffn W1
            pl.BlockSpec((1, 1, F), l_map),         # ffn b1
            pl.BlockSpec((1, D, F), l_map),         # ffn W2
            pl.BlockSpec((1, 1, D), l_map),         # ffn b2
            pl.BlockSpec((1, 3, D), l_map),         # LN gammas (3 per layer)
            pl.BlockSpec((1, 3, D), l_map),         # LN betas
        ],
        out_specs=[
            pl.BlockSpec((Nb, T, D), b_map),        # decoder features
            pl.BlockSpec((Nb, T, C), b_map),        # cls logits
        ],
        scratch_shapes=[
            pltpu.VMEM((Nb * T, D), jnp.float32),   # decoder state x (layer carry)
            pltpu.VMEM((Nb * T, D), jnp.float32),   # encoder memory
        ],
    )

    out, logits = pl.pallas_call(
        kernel,
        grid_spec=grid_spec,
        out_shape=(jax.ShapeDtypeStruct((N, T, D), jnp.float32),
                   jax.ShapeDtypeStruct((N, T, C), jnp.float32)),
        compiler_params=pltpu.CompilerParams(
            dimension_semantics=("parallel", "arbitrary"),
            vmem_limit_bytes=_derive_vmem_limit(Nb, T, C, D, F,
                                                jnp.dtype(wd).itemsize)),
    )(tokens, mask_add, pe,
      params['proj_w'].astype(wd), params['cls_w'].astype(wd), params['cls_b'],
      sa_in_w, sa_in_b, params['sa_out_w'].astype(wd), params['sa_out_b'],
      ca_in_w, ca_in_b, params['ca_out_w'].astype(wd), params['ca_out_b'],
      params['ff_w1'].astype(wd), params['ff_b1'],
      params['ff_w2'].astype(wd), params['ff_b2'],
      params['ln_g'], params['ln_b'])

    return out, logits


def pretrain_lan_forward(input_logits, lengths, params, config, **kw):
    """PretrainLan.forward: tokens = softmax(logits, -1); run PermutedLanguage decoder."""
    # TODO(synk): the PyTorch PretrainLan passes a malformed tuple to the decoder;
    # we implement the intended (softmax(logits), lengths) call.
    return permuted_language_forward(input_logits, lengths, params, config,
                                     softmax_tokens=True, **kw)


# ----------------------------------------------------------------------------
# pure-JAX reference (same math, no Pallas) for validation
# ----------------------------------------------------------------------------
def _ref_mha(q_in, kv_in, in_w, in_b, out_w, out_b, mask_add, nhead):
    D = out_w.shape[0]
    hd = D // nhead
    q = q_in @ in_w[:D].T + in_b[0]
    k = kv_in @ in_w[D:2 * D].T + in_b[1]
    v = kv_in @ in_w[2 * D:].T + in_b[2]
    scale = 1.0 / math.sqrt(hd)
    heads = []
    for h in range(nhead):
        s = (q[:, h * hd:(h + 1) * hd] * scale) @ k[:, h * hd:(h + 1) * hd].T + mask_add
        p = jax.nn.softmax(s, axis=-1)
        heads.append(p @ v[:, h * hd:(h + 1) * hd])
    o = jnp.concatenate(heads, axis=-1)
    return o @ out_w.T + out_b


def reference_forward(tokens, lengths, params, config, *, softmax_tokens=False):
    N, T, C = tokens.shape
    D = config['d_model']
    if softmax_tokens:
        tokens = jax.nn.softmax(tokens, axis=-1)
    pe = positional_encoding(T, D)
    embed = tokens @ params['proj_w'].T + pe[None]
    mask = jnp.where(jnp.arange(T)[None, :] >= lengths[:, None], NEG_INF, 0.0)
    mask = mask.astype(jnp.float32)                                     # (N, T)
    outs = []
    for n in range(N):
        x = pe
        m = mask[n][None, :]                                            # (1, T)
        for l in range(config['num_layers']):
            sa = _ref_mha(x, x, params['sa_in_w'][l], params['sa_in_b'][l],
                          params['sa_out_w'][l], params['sa_out_b'][l], m, config['nhead'])
            x = _layer_norm(x + sa, params['ln_g'][l, 0:1], params['ln_b'][l, 0:1])
            ca = _ref_mha(x, embed[n], params['ca_in_w'][l], params['ca_in_b'][l],
                          params['ca_out_w'][l], params['ca_out_b'][l], m, config['nhead'])
            x = _layer_norm(x + ca, params['ln_g'][l, 1:2], params['ln_b'][l, 1:2])
            h = jnp.maximum(x @ params['ff_w1'][l].T + params['ff_b1'][l], 0.0)
            x = _layer_norm(x + h @ params['ff_w2'][l].T + params['ff_b2'][l],
                            params['ln_g'][l, 2:3], params['ln_b'][l, 2:3])
        outs.append(x)
    out = jnp.stack(outs)
    logits = out @ params['cls_w'].T + params['cls_b']
    return out, logits


# ----------------------------------------------------------------------------
# deterministic parameter init (synthetic weights; shapes match the nn.Module,
# per-layer weights stacked on a leading num_layers axis)
# ----------------------------------------------------------------------------
def init_params(key, config):
    D, C, F = config['d_model'], config['n_classes'], config['d_inner']
    L = config['num_layers']

    def nrm(k, shape, scale=0.05):
        return scale * jax.random.normal(k, shape, jnp.float32)

    keys = jax.random.split(key, 13)
    return {
        'proj_w':   nrm(keys[0], (D, C)),
        'cls_w':    nrm(keys[1], (C, D)),
        'cls_b':    nrm(keys[2], (1, C), 0.02),
        'sa_in_w':  nrm(keys[3], (L, 3 * D, D)),
        'sa_in_b':  nrm(keys[4], (L, 3, D), 0.02),     # rows = (q, k, v) bias
        'sa_out_w': nrm(keys[5], (L, D, D)),
        'sa_out_b': nrm(keys[6], (L, 1, D), 0.02),
        'ca_in_w':  nrm(keys[7], (L, 3 * D, D)),
        'ca_in_b':  nrm(keys[8], (L, 3, D), 0.02),
        'ca_out_w': nrm(keys[9], (L, D, D)),
        'ca_out_b': nrm(keys[10], (L, 1, D), 0.02),
        'ff_w1':    nrm(keys[11], (L, F, D)),
        'ff_b1':    jnp.zeros((L, 1, F), jnp.float32),
        'ff_w2':    nrm(keys[12], (L, D, F)),
        'ff_b2':    jnp.zeros((L, 1, D), jnp.float32),
        'ln_g':     jnp.ones((L, 3, D), jnp.float32),
        'ln_b':     jnp.zeros((L, 3, D), jnp.float32),
    }


if __name__ == "__main__":
    config = dict(d_model=32, nhead=4, d_inner=64, num_layers=2,
                  n_classes=8, token_max_length=8)

    key = jax.random.PRNGKey(0)
    kp, kt = jax.random.split(key)
    params = init_params(kp, config)

    N, T, C = 2, config['token_max_length'], config['n_classes']
    raw_logits = jax.random.normal(kt, (N, T, C), jnp.float32)   # PretrainLan input logits
    lengths = jnp.array([5, 8], jnp.int32)                       # (N,)

    ref_out, ref_logits = reference_forward(raw_logits, lengths, params, config,
                                            softmax_tokens=True)

    # f32 path: one sequence per batch block -> grid (2 'parallel', L 'arbitrary')
    out, logits = pretrain_lan_forward(raw_logits, lengths, params, config,
                                       batch_block=1, use_bf16=False)
    jax.block_until_ready((out, logits))
    assert out.shape == (N, T, config['d_model']) and logits.shape == (N, T, C)
    assert jnp.allclose(out, ref_out, atol=2e-3, rtol=2e-3), \
        float(jnp.max(jnp.abs(out - ref_out)))
    assert jnp.allclose(logits, ref_logits, atol=2e-3, rtol=2e-3), \
        float(jnp.max(jnp.abs(logits - ref_logits)))

    # bf16-matmul path (v6e/v7x MXU-native weights), whole batch in one block
    out_bf, logits_bf = pretrain_lan_forward(raw_logits, lengths, params, config,
                                             batch_block=2, use_bf16=True)
    jax.block_until_ready((out_bf, logits_bf))
    assert jnp.allclose(out_bf, ref_out, atol=1e-1, rtol=1e-1), \
        float(jnp.max(jnp.abs(out_bf - ref_out)))
    assert jnp.allclose(logits_bf, ref_logits, atol=1e-1, rtol=1e-1), \
        float(jnp.max(jnp.abs(logits_bf - ref_logits)))

    print("KERNEL_OK")
</pallas_src>

<mosaic_0001>
module attributes {stable_mosaic.version = 11 : i64} {
  func.func @_fused_forward_kernel(%arg0: i32, %arg1: i32, %arg2: memref<1x8x8xf32, #tpu.memory_space<vmem>>, %arg3: memref<1x1x8xf32, #tpu.memory_space<vmem>>, %arg4: memref<8x32xf32, #tpu.memory_space<vmem>>, %arg5: memref<32x8xf32, #tpu.memory_space<vmem>>, %arg6: memref<8x32xf32, #tpu.memory_space<vmem>>, %arg7: memref<1x8xf32, #tpu.memory_space<vmem>>, %arg8: memref<1x96x32xf32, #tpu.memory_space<vmem>>, %arg9: memref<1x3x32xf32, #tpu.memory_space<vmem>>, %arg10: memref<1x32x32xf32, #tpu.memory_space<vmem>>, %arg11: memref<1x1x32xf32, #tpu.memory_space<vmem>>, %arg12: memref<1x96x32xf32, #tpu.memory_space<vmem>>, %arg13: memref<1x3x32xf32, #tpu.memory_space<vmem>>, %arg14: memref<1x32x32xf32, #tpu.memory_space<vmem>>, %arg15: memref<1x1x32xf32, #tpu.memory_space<vmem>>, %arg16: memref<1x64x32xf32, #tpu.memory_space<vmem>>, %arg17: memref<1x1x64xf32, #tpu.memory_space<vmem>>, %arg18: memref<1x32x64xf32, #tpu.memory_space<vmem>>, %arg19: memref<1x1x32xf32, #tpu.memory_space<vmem>>, %arg20: memref<1x3x32xf32, #tpu.memory_space<vmem>>, %arg21: memref<1x3x32xf32, #tpu.memory_space<vmem>>, %arg22: memref<1x8x32xf32, #tpu.memory_space<vmem>>, %arg23: memref<1x8x8xf32, #tpu.memory_space<vmem>>, %arg24: memref<8x32xf32, #tpu.memory_space<vmem>>, %arg25: memref<8x32xf32, #tpu.memory_space<vmem>>) attributes {dimension_semantics = [#tpu.dimension_semantics<parallel>, #tpu.dimension_semantics<arbitrary>], iteration_bounds = array<i64: 2, 2>, scalar_prefetch = 0 : i64, scratch_operands = 2 : i64, tpu.core_type = #tpu.core_type<tc>, window_params = [{transform_indices = @transform_0, window_bounds = array<i64: 1, 8, 8>}, {transform_indices = @transform_1, window_bounds = array<i64: 1, 1, 8>}, {pipeline_mode = #tpu.pipeline_mode<synchronous>, transform_indices = @transform_2, window_bounds = array<i64: 8, 32>}, {pipeline_mode = #tpu.pipeline_mode<synchronous>, transform_indices = @transform_3, window_bounds = array<i64: 32, 8>}, {pipeline_mode = #tpu.pipeline_mode<synchronous>, transform_indices = @transform_4, window_bounds = array<i64: 8, 32>}, {pipeline_mode = #tpu.pipeline_mode<synchronous>, transform_indices = @transform_5, window_bounds = array<i64: 1, 8>}, {transform_indices = @transform_6, window_bounds = array<i64: 1, 96, 32>}, {transform_indices = @transform_7, window_bounds = array<i64: 1, 3, 32>}, {transform_indices = @transform_8, window_bounds = array<i64: 1, 32, 32>}, {transform_indices = @transform_9, window_bounds = array<i64: 1, 1, 32>}, {transform_indices = @transform_10, window_bounds = array<i64: 1, 96, 32>}, {transform_indices = @transform_11, window_bounds = array<i64: 1, 3, 32>}, {transform_indices = @transform_12, window_bounds = array<i64: 1, 32, 32>}, {transform_indices = @transform_13, window_bounds = array<i64: 1, 1, 32>}, {transform_indices = @transform_14, window_bounds = array<i64: 1, 64, 32>}, {transform_indices = @transform_15, window_bounds = array<i64: 1, 1, 64>}, {transform_indices = @transform_16, window_bounds = array<i64: 1, 32, 64>}, {transform_indices = @transform_17, window_bounds = array<i64: 1, 1, 32>}, {transform_indices = @transform_18, window_bounds = array<i64: 1, 3, 32>}, {transform_indices = @transform_19, window_bounds = array<i64: 1, 3, 32>}, {transform_indices = @transform_20, window_bounds = array<i64: 1, 8, 32>}, {transform_indices = @transform_21, window_bounds = array<i64: 1, 8, 8>}]} {
    %c0 = arith.constant 0 : index
    %c0_0 = arith.constant 0 : index
    %c0_1 = arith.constant 0 : index
    %0 = vector.load %arg3[%c0, %c0_0, %c0_1] : memref<1x1x8xf32, #tpu.memory_space<vmem>>, vector<1x1x8xf32>
    %c0_i32 = arith.constant 0 : i32
    %1 = arith.cmpi eq, %arg1, %c0_i32 : i32
    %2 = arith.extui %1 : i1 to i32
    %c0_i32_2 = arith.constant 0 : i32
    %3 = arith.cmpi ne, %2, %c0_i32_2 : i32
    scf.if %3 {
      %c0_109 = arith.constant 0 : index
      %c0_110 = arith.constant 0 : index
      %c0_111 = arith.constant 0 : index
      %303 = vector.load %arg2[%c0_109, %c0_110, %c0_111] : memref<1x8x8xf32, #tpu.memory_space<vmem>>, vector<1x8x8xf32>
      %304 = vector.shape_cast %303 : vector<1x8x8xf32> to vector<8x8xf32>
      %cst_112 = arith.constant dense<0xFF800000> : vector<8xf32>
      %305 = vector.multi_reduction <maximumf>, %304, %cst_112 [1] : vector<8x8xf32> to vector<8xf32>
      %306 = vector.shape_cast %305 : vector<8xf32> to vector<8x1xf32>
      %307 = vector.broadcast %306 : vector<8x1xf32> to vector<8x8xf32>
      %308 = arith.subf %304, %307 : vector<8x8xf32>
      %309 = math.exp %308 : vector<8x8xf32>
      %cst_113 = arith.constant dense<0.000000e+00> : vector<8xf32>
      %310 = vector.multi_reduction <add>, %309, %cst_113 [1] : vector<8x8xf32> to vector<8xf32>
      %311 = vector.shape_cast %310 : vector<8xf32> to vector<8x1xf32>
      %312 = tpu.reciprocal %311 {approx = true} : vector<8x1xf32> -> vector<8x1xf32>
      %313 = vector.broadcast %312 : vector<8x1xf32> to vector<8x8xf32>
      %314 = arith.mulf %309, %313 : vector<8x8xf32>
      %c0_114 = arith.constant 0 : index
      %c0_115 = arith.constant 0 : index
      %315 = vector.load %arg4[%c0_114, %c0_115] : memref<8x32xf32, #tpu.memory_space<vmem>>, vector<8x32xf32>
      %c0_116 = arith.constant 0 : index
      %c0_117 = arith.constant 0 : index
      %316 = vector.load %arg5[%c0_116, %c0_117] : memref<32x8xf32, #tpu.memory_space<vmem>>, vector<32x8xf32>
      %cst_118 = arith.constant dense<0.000000e+00> : vector<8x32xf32>
      %317 = tpu.matmul %314, %316, %cst_118 {dimension_numbers = #tpu.dot_dimension_numbers<[1], [1], [0], [0], [0, 0, 1, 0], [], []>} : vector<8x8xf32>, vector<32x8xf32>, vector<8x32xf32> -> vector<8x32xf32>
      %318 = arith.addf %317, %315 : vector<8x32xf32>
      %c0_119 = arith.constant 0 : index
      %c0_120 = arith.constant 0 : index
      %319 = vector.load %arg25[%c0_119, %c0_120] : memref<8x32xf32, #tpu.memory_space<vmem>>, vector<8x32xf32>
      tpu.vector_store %arg25[%c0_119, %c0_120], %318 {strides = array<i32>} : memref<8x32xf32, #tpu.memory_space<vmem>>, vector<8x32xf32>,
      %c0_121 = arith.constant 0 : index
      %c0_122 = arith.constant 0 : index
      %320 = vector.load %arg24[%c0_121, %c0_122] : memref<8x32xf32, #tpu.memory_space<vmem>>, vector<8x32xf32>
      tpu.vector_store %arg24[%c0_121, %c0_122], %315 {strides = array<i32>} : memref<8x32xf32, #tpu.memory_space<vmem>>, vector<8x32xf32>,
    } else {
    }
    %c0_3 = arith.constant 0 : index
    %c0_4 = arith.constant 0 : index
    %4 = vector.load %arg24[%c0_3, %c0_4] : memref<8x32xf32, #tpu.memory_space<vmem>>, vector<8x32xf32>
    %c0_5 = arith.constant 0 : index
    %c0_6 = arith.constant 0 : index
    %5 = vector.load %arg25[%c0_5, %c0_6] : memref<8x32xf32, #tpu.memory_space<vmem>>, vector<8x32xf32>
    %c0_7 = arith.constant 0 : index
    %c0_8 = arith.constant 0 : index
    %c0_9 = arith.constant 0 : index
    %6 = vector.load %arg20[%c0_7, %c0_8, %c0_9] : memref<1x3x32xf32, #tpu.memory_space<vmem>>, vector<1x3x32xf32>
    %7 = vector.shape_cast %6 : vector<1x3x32xf32> to vector<3x32xf32>
    %c0_10 = arith.constant 0 : index
    %c0_11 = arith.constant 0 : index
    %c0_12 = arith.constant 0 : index
    %8 = vector.load %arg21[%c0_10, %c0_11, %c0_12] : memref<1x3x32xf32, #tpu.memory_space<vmem>>, vector<1x3x32xf32>
    %9 = vector.shape_cast %8 : vector<1x3x32xf32> to vector<3x32xf32>
    %c0_13 = arith.constant 0 : index
    %c0_14 = arith.constant 0 : index
    %c0_15 = arith.constant 0 : index
    %10 = vector.load %arg8[%c0_13, %c0_14, %c0_15] : memref<1x96x32xf32, #tpu.memory_space<vmem>>, vector<1x96x32xf32>
    %11 = vector.shape_cast %10 : vector<1x96x32xf32> to vector<96x32xf32>
    %c0_16 = arith.constant 0 : index
    %c0_17 = arith.constant 0 : index
    %c0_18 = arith.constant 0 : index
    %12 = vector.load %arg9[%c0_16, %c0_17, %c0_18] : memref<1x3x32xf32, #tpu.memory_space<vmem>>, vector<1x3x32xf32>
    %13 = vector.shape_cast %12 : vector<1x3x32xf32> to vector<3x32xf32>
    %14 = vector.extract_strided_slice %11 {offsets = [0, 0], sizes = [32, 32], strides = [1, 1]} : vector<96x32xf32> to vector<32x32xf32>
    %cst = arith.constant dense<0.000000e+00> : vector<8x32xf32>
    %15 = tpu.matmul %4, %14, %cst {dimension_numbers = #tpu.dot_dimension_numbers<[1], [1], [0], [0], [0, 0, 1, 0], [], []>} : vector<8x32xf32>, vector<32x32xf32>, vector<8x32xf32> -> vector<8x32xf32>
    %16 = vector.extract_strided_slice %13 {offsets = [0, 0], sizes = [1, 32], strides = [1, 1]} : vector<3x32xf32> to vector<1x32xf32>
    %17 = vector.broadcast %16 : vector<1x32xf32> to vector<8x32xf32>
    %18 = arith.addf %15, %17 : vector<8x32xf32>
    %19 = vector.extract_strided_slice %11 {offsets = [32, 0], sizes = [32, 32], strides = [1, 1]} : vector<96x32xf32> to vector<32x32xf32>
    %cst_19 = arith.constant dense<0.000000e+00> : vector<8x32xf32>
    %20 = tpu.matmul %4, %19, %cst_19 {dimension_numbers = #tpu.dot_dimension_numbers<[1], [1], [0], [0], [0, 0, 1, 0], [], []>} : vector<8x32xf32>, vector<32x32xf32>, vector<8x32xf32> -> vector<8x32xf32>
    %21 = vector.extract_strided_slice %13 {offsets = [1, 0], sizes = [1, 32], strides = [1, 1]} : vector<3x32xf32> to vector<1x32xf32>
    %22 = vector.broadcast %21 : vector<1x32xf32> to vector<8x32xf32>
    %23 = arith.addf %20, %22 : vector<8x32xf32>
    %24 = vector.extract_strided_slice %11 {offsets = [64, 0], sizes = [32, 32], strides = [1, 1]} : vector<96x32xf32> to vector<32x32xf32>
    %cst_20 = arith.constant dense<0.000000e+00> : vector<8x32xf32>
    %25 = tpu.matmul %4, %24, %cst_20 {dimension_numbers = #tpu.dot_dimension_numbers<[1], [1], [0], [0], [0, 0, 1, 0], [], []>} : vector<8x32xf32>, vector<32x32xf32>, vector<8x32xf32> -> vector<8x32xf32>
    %26 = vector.extract_strided_slice %13 {offsets = [2, 0], sizes = [1, 32], strides = [1, 1]} : vector<3x32xf32> to vector<1x32xf32>
    %27 = vector.broadcast %26 : vector<1x32xf32> to vector<8x32xf32>
    %28 = arith.addf %25, %27 : vector<8x32xf32>
    %c0_21 = arith.constant 0 : index
    %c0_22 = arith.constant 0 : index
    %c0_23 = arith.constant 0 : index
    %29 = vector.load %arg10[%c0_21, %c0_22, %c0_23] : memref<1x32x32xf32, #tpu.memory_space<vmem>>, vector<1x32x32xf32>
    %30 = vector.shape_cast %29 : vector<1x32x32xf32> to vector<32x32xf32>
    %c0_24 = arith.constant 0 : index
    %c0_25 = arith.constant 0 : index
    %c0_26 = arith.constant 0 : index
    %31 = vector.load %arg11[%c0_24, %c0_25, %c0_26] : memref<1x1x32xf32, #tpu.memory_space<vmem>>, vector<1x1x32xf32>
    %32 = vector.shape_cast %31 : vector<1x1x32xf32> to vector<1x32xf32>
    %33 = vector.shape_cast %18 : vector<8x32xf32> to vector<1x8x32xf32>
    %34 = vector.shape_cast %23 : vector<8x32xf32> to vector<1x8x32xf32>
    %35 = vector.shape_cast %28 : vector<8x32xf32> to vector<1x8x32xf32>
    %36 = vector.extract_strided_slice %33 {offsets = [0, 0, 0], sizes = [1, 8, 8], strides = [1, 1, 1]} : vector<1x8x32xf32> to vector<1x8x8xf32>
    %37 = vector.extract_strided_slice %34 {offsets = [0, 0, 0], sizes = [1, 8, 8], strides = [1, 1, 1]} : vector<1x8x32xf32> to vector<1x8x8xf32>
    "tpu.trace_start"() <{level = 10 : i32, message = "bqd,bkd->bqk"}> : () -> ()
    %cst_27 = arith.constant dense<0.000000e+00> : vector<1x8x8xf32>
    %38 = tpu.matmul %36, %37, %cst_27 {dimension_numbers = #tpu.dot_dimension_numbers<[2], [2], [1], [1], [0, 0, 0, 1, 1, 1], [0], [0]>} : vector<1x8x8xf32>, vector<1x8x8xf32>, vector<1x8x8xf32> -> vector<1x8x8xf32>
    "tpu.trace_stop"() : () -> ()
    %39 = vector.broadcast %0 : vector<1x1x8xf32> to vector<1x8x8xf32>
    %40 = arith.addf %38, %39 : vector<1x8x8xf32>
    %cst_28 = arith.constant dense<0xFF800000> : vector<1x8xf32>
    %41 = vector.multi_reduction <maximumf>, %40, %cst_28 [2] : vector<1x8x8xf32> to vector<1x8xf32>
    %42 = vector.shape_cast %41 : vector<1x8xf32> to vector<1x8x1xf32>
    %43 = vector.broadcast %42 : vector<1x8x1xf32> to vector<1x8x8xf32>
    %44 = arith.subf %40, %43 : vector<1x8x8xf32>
    %45 = math.exp %44 : vector<1x8x8xf32>
    %cst_29 = arith.constant dense<0.000000e+00> : vector<1x8xf32>
    %46 = vector.multi_reduction <add>, %45, %cst_29 [2] : vector<1x8x8xf32> to vector<1x8xf32>
    %47 = vector.shape_cast %46 : vector<1x8xf32> to vector<1x8x1xf32>
    %48 = tpu.reciprocal %47 {approx = true} : vector<1x8x1xf32> -> vector<1x8x1xf32>
    %49 = vector.broadcast %48 : vector<1x8x1xf32> to vector<1x8x8xf32>
    %50 = arith.mulf %45, %49 : vector<1x8x8xf32>
    %51 = vector.extract_strided_slice %35 {offsets = [0, 0, 0], sizes = [1, 8, 8], strides = [1, 1, 1]} : vector<1x8x32xf32> to vector<1x8x8xf32>
    "tpu.trace_start"() <{level = 10 : i32, message = "bqk,bkd->bqd"}> : () -> ()
    %cst_30 = arith.constant dense<0.000000e+00> : vector<1x8x8xf32>
    %52 = tpu.matmul %50, %51, %cst_30 {dimension_numbers = #tpu.dot_dimension_numbers<[2], [1], [1], [2], [0, 0, 0, 1, 1, 2], [0], [0]>} : vector<1x8x8xf32>, vector<1x8x8xf32>, vector<1x8x8xf32> -> vector<1x8x8xf32>
    "tpu.trace_stop"() : () -> ()
    %53 = vector.extract_strided_slice %33 {offsets = [0, 0, 8], sizes = [1, 8, 8], strides = [1, 1, 1]} : vector<1x8x32xf32> to vector<1x8x8xf32>
    %54 = vector.extract_strided_slice %34 {offsets = [0, 0, 8], sizes = [1, 8, 8], strides = [1, 1, 1]} : vector<1x8x32xf32> to vector<1x8x8xf32>
    "tpu.trace_start"() <{level = 10 : i32, message = "bqd,bkd->bqk"}> : () -> ()
    %cst_31 = arith.constant dense<0.000000e+00> : vector<1x8x8xf32>
    %55 = tpu.matmul %53, %54, %cst_31 {dimension_numbers = #tpu.dot_dimension_numbers<[2], [2], [1], [1], [0, 0, 0, 1, 1, 1], [0], [0]>} : vector<1x8x8xf32>, vector<1x8x8xf32>, vector<1x8x8xf32> -> vector<1x8x8xf32>
    "tpu.trace_stop"() : () -> ()
    %56 = vector.broadcast %0 : vector<1x1x8xf32> to vector<1x8x8xf32>
    %57 = arith.addf %55, %56 : vector<1x8x8xf32>
    %cst_32 = arith.constant dense<0xFF800000> : vector<1x8xf32>
    %58 = vector.multi_reduction <maximumf>, %57, %cst_32 [2] : vector<1x8x8xf32> to vector<1x8xf32>
    %59 = vector.shape_cast %58 : vector<1x8xf32> to vector<1x8x1xf32>
    %60 = vector.broadcast %59 : vector<1x8x1xf32> to vector<1x8x8xf32>
    %61 = arith.subf %57, %60 : vector<1x8x8xf32>
    %62 = math.exp %61 : vector<1x8x8xf32>
    %cst_33 = arith.constant dense<0.000000e+00> : vector<1x8xf32>
    %63 = vector.multi_reduction <add>, %62, %cst_33 [2] : vector<1x8x8xf32> to vector<1x8xf32>
    %64 = vector.shape_cast %63 : vector<1x8xf32> to vector<1x8x1xf32>
    %65 = tpu.reciprocal %64 {approx = true} : vector<1x8x1xf32> -> vector<1x8x1xf32>
    %66 = vector.broadcast %65 : vector<1x8x1xf32> to vector<1x8x8xf32>
    %67 = arith.mulf %62, %66 : vector<1x8x8xf32>
    %68 = vector.extract_strided_slice %35 {offsets = [0, 0, 8], sizes = [1, 8, 8], strides = [1, 1, 1]} : vector<1x8x32xf32> to vector<1x8x8xf32>
    "tpu.trace_start"() <{level = 10 : i32, message = "bqk,bkd->bqd"}> : () -> ()
    %cst_34 = arith.constant dense<0.000000e+00> : vector<1x8x8xf32>
    %69 = tpu.matmul %67, %68, %cst_34 {dimension_numbers = #tpu.dot_dimension_numbers<[2], [1], [1], [2], [0, 0, 0, 1, 1, 2], [0], [0]>} : vector<1x8x8xf32>, vector<1x8x8xf32>, vector<1x8x8xf32> -> vector<1x8x8xf32>
    "tpu.trace_stop"() : () -> ()
    %70 = vector.extract_strided_slice %33 {offsets = [0, 0, 16], sizes = [1, 8, 8], strides = [1, 1, 1]} : vector<1x8x32xf32> to vector<1x8x8xf32>
    %71 = vector.extract_strided_slice %34 {offsets = [0, 0, 16], sizes = [1, 8, 8], strides = [1, 1, 1]} : vector<1x8x32xf32> to vector<1x8x8xf32>
    "tpu.trace_start"() <{level = 10 : i32, message = "bqd,bkd->bqk"}> : () -> ()
    %cst_35 = arith.constant dense<0.000000e+00> : vector<1x8x8xf32>
    %72 = tpu.matmul %70, %71, %cst_35 {dimension_numbers = #tpu.dot_dimension_numbers<[2], [2], [1], [1], [0, 0, 0, 1, 1, 1], [0], [0]>} : vector<1x8x8xf32>, vector<1x8x8xf32>, vector<1x8x8xf32> -> vector<1x8x8xf32>
    "tpu.trace_stop"() : () -> ()
    %73 = vector.broadcast %0 : vector<1x1x8xf32> to vector<1x8x8xf32>
    %74 = arith.addf %72, %73 : vector<1x8x8xf32>
    %cst_36 = arith.constant dense<0xFF800000> : vector<1x8xf32>
    %75 = vector.multi_reduction <maximumf>, %74, %cst_36 [2] : vector<1x8x8xf32> to vector<1x8xf32>
    %76 = vector.shape_cast %75 : vector<1x8xf32> to vector<1x8x1xf32>
    %77 = vector.broadcast %76 : vector<1x8x1xf32> to vector<1x8x8xf32>
    %78 = arith.subf %74, %77 : vector<1x8x8xf32>
    %79 = math.exp %78 : vector<1x8x8xf32>
    %cst_37 = arith.constant dense<0.000000e+00> : vector<1x8xf32>
    %80 = vector.multi_reduction <add>, %79, %cst_37 [2] : vector<1x8x8xf32> to vector<1x8xf32>
    %81 = vector.shape_cast %80 : vector<1x8xf32> to vector<1x8x1xf32>
    %82 = tpu.reciprocal %81 {approx = true} : vector<1x8x1xf32> -> vector<1x8x1xf32>
    %83 = vector.broadcast %82 : vector<1x8x1xf32> to vector<1x8x8xf32>
    %84 = arith.mulf %79, %83 : vector<1x8x8xf32>
    %85 = vector.extract_strided_slice %35 {offsets = [0, 0, 16], sizes = [1, 8, 8], strides = [1, 1, 1]} : vector<1x8x32xf32> to vector<1x8x8xf32>
    "tpu.trace_start"() <{level = 10 : i32, message = "bqk,bkd->bqd"}> : () -> ()
    %cst_38 = arith.constant dense<0.000000e+00> : vector<1x8x8xf32>
    %86 = tpu.matmul %84, %85, %cst_38 {dimension_numbers = #tpu.dot_dimension_numbers<[2], [1], [1], [2], [0, 0, 0, 1, 1, 2], [0], [0]>} : vector<1x8x8xf32>, vector<1x8x8xf32>, vector<1x8x8xf32> -> vector<1x8x8xf32>
    "tpu.trace_stop"() : () -> ()
    %87 = vector.extract_strided_slice %33 {offsets = [0, 0, 24], sizes = [1, 8, 8], strides = [1, 1, 1]} : vector<1x8x32xf32> to vector<1x8x8xf32>
    %88 = vector.extract_strided_slice %34 {offsets = [0, 0, 24], sizes = [1, 8, 8], strides = [1, 1, 1]} : vector<1x8x32xf32> to vector<1x8x8xf32>
    "tpu.trace_start"() <{level = 10 : i32, message = "bqd,bkd->bqk"}> : () -> ()
    %cst_39 = arith.constant dense<0.000000e+00> : vector<1x8x8xf32>
    %89 = tpu.matmul %87, %88, %cst_39 {dimension_numbers = #tpu.dot_dimension_numbers<[2], [2], [1], [1], [0, 0, 0, 1, 1, 1], [0], [0]>} : vector<1x8x8xf32>, vector<1x8x8xf32>, vector<1x8x8xf32> -> vector<1x8x8xf32>
    "tpu.trace_stop"() : () -> ()
    %90 = vector.broadcast %0 : vector<1x1x8xf32> to vector<1x8x8xf32>
    %91 = arith.addf %89, %90 : vector<1x8x8xf32>
    %cst_40 = arith.constant dense<0xFF800000> : vector<1x8xf32>
    %92 = vector.multi_reduction <maximumf>, %91, %cst_40 [2] : vector<1x8x8xf32> to vector<1x8xf32>
    %93 = vector.shape_cast %92 : vector<1x8xf32> to vector<1x8x1xf32>
    %94 = vector.broadcast %93 : vector<1x8x1xf32> to vector<1x8x8xf32>
    %95 = arith.subf %91, %94 : vector<1x8x8xf32>
    %96 = math.exp %95 : vector<1x8x8xf32>
    %cst_41 = arith.constant dense<0.000000e+00> : vector<1x8xf32>
    %97 = vector.multi_reduction <add>, %96, %cst_41 [2] : vector<1x8x8xf32> to vector<1x8xf32>
    %98 = vector.shape_cast %97 : vector<1x8xf32> to vector<1x8x1xf32>
    %99 = tpu.reciprocal %98 {approx = true} : vector<1x8x1xf32> -> vector<1x8x1xf32>
    %100 = vector.broadcast %99 : vector<1x8x1xf32> to vector<1x8x8xf32>
    %101 = arith.mulf %96, %100 : vector<1x8x8xf32>
    %102 = vector.extract_strided_slice %35 {offsets = [0, 0, 24], sizes = [1, 8, 8], strides = [1, 1, 1]} : vector<1x8x32xf32> to vector<1x8x8xf32>
    "tpu.trace_start"() <{level = 10 : i32, message = "bqk,bkd->bqd"}> : () -> ()
    %cst_42 = arith.constant dense<0.000000e+00> : vector<1x8x8xf32>
    %103 = tpu.matmul %101, %102, %cst_42 {dimension_numbers = #tpu.dot_dimension_numbers<[2], [1], [1], [2], [0, 0, 0, 1, 1, 2], [0], [0]>} : vector<1x8x8xf32>, vector<1x8x8xf32>, vector<1x8x8xf32> -> vector<1x8x8xf32>
    "tpu.trace_stop"() : () -> ()
    %104 = tpu.concatenate %52, %69, %86, %103 in 2 : vector<1x8x8xf32>, vector<1x8x8xf32>, vector<1x8x8xf32>, vector<1x8x8xf32> -> vector<1x8x32xf32>
    %105 = vector.shape_cast %104 : vector<1x8x32xf32> to vector<8x32xf32>
    %cst_43 = arith.constant dense<0.000000e+00> : vector<8x32xf32>
    %106 = tpu.matmul %105, %30, %cst_43 {dimension_numbers = #tpu.dot_dimension_numbers<[1], [1], [0], [0], [0, 0, 1, 0], [], []>} : vector<8x32xf32>, vector<32x32xf32>, vector<8x32xf32> -> vector<8x32xf32>
    %107 = vector.broadcast %32 : vector<1x32xf32> to vector<8x32xf32>
    %108 = arith.addf %106, %107 : vector<8x32xf32>
    %109 = arith.addf %4, %108 : vector<8x32xf32>
    %110 = vector.extract_strided_slice %7 {offsets = [0, 0], sizes = [1, 32], strides = [1, 1]} : vector<3x32xf32> to vector<1x32xf32>
    %111 = vector.extract_strided_slice %9 {offsets = [0, 0], sizes = [1, 32], strides = [1, 1]} : vector<3x32xf32> to vector<1x32xf32>
    %cst_44 = arith.constant dense<0.000000e+00> : vector<8xf32>
    %112 = vector.multi_reduction <add>, %109, %cst_44 [1] : vector<8x32xf32> to vector<8xf32>
    %113 = vector.shape_cast %112 : vector<8xf32> to vector<8x1xf32>
    %cst_45 = arith.constant 3.200000e+01 : f32
    %114 = vector.broadcast %cst_45 : f32 to vector<8x1xf32>
    %115 = arith.divf %113, %114 : vector<8x1xf32>
    %116 = vector.broadcast %115 : vector<8x1xf32> to vector<8x32xf32>
    %117 = arith.subf %109, %116 : vector<8x32xf32>
    %118 = arith.mulf %117, %117 : vector<8x32xf32>
    %cst_46 = arith.constant dense<0.000000e+00> : vector<8xf32>
    %119 = vector.multi_reduction <add>, %118, %cst_46 [1] : vector<8x32xf32> to vector<8xf32>
    %120 = vector.shape_cast %119 : vector<8xf32> to vector<8x1xf32>
    %cst_47 = arith.constant 3.200000e+01 : f32
    %121 = vector.broadcast %cst_47 : f32 to vector<8x1xf32>
    %122 = arith.divf %120, %121 : vector<8x1xf32>
    %123 = vector.broadcast %115 : vector<8x1xf32> to vector<8x32xf32>
    %124 = arith.subf %109, %123 : vector<8x32xf32>
    %cst_48 = arith.constant 9.99999974E-6 : f32
    %125 = vector.broadcast %cst_48 : f32 to vector<8x1xf32>
    %126 = arith.addf %122, %125 : vector<8x1xf32>
    %127 = math.rsqrt %126 : vector<8x1xf32>
    %128 = vector.broadcast %127 : vector<8x1xf32> to vector<8x32xf32>
    %129 = arith.mulf %124, %128 : vector<8x32xf32>
    %130 = vector.broadcast %110 : vector<1x32xf32> to vector<8x32xf32>
    %131 = arith.mulf %129, %130 : vector<8x32xf32>
    %132 = vector.broadcast %111 : vector<1x32xf32> to vector<8x32xf32>
    %133 = arith.addf %131, %132 : vector<8x32xf32>
    %c0_49 = arith.constant 0 : index
    %c0_50 = arith.constant 0 : index
    %c0_51 = arith.constant 0 : index
    %134 = vector.load %arg12[%c0_49, %c0_50, %c0_51] : memref<1x96x32xf32, #tpu.memory_space<vmem>>, vector<1x96x32xf32>
    %135 = vector.shape_cast %134 : vector<1x96x32xf32> to vector<96x32xf32>
    %c0_52 = arith.constant 0 : index
    %c0_53 = arith.constant 0 : index
    %c0_54 = arith.constant 0 : index
    %136 = vector.load %arg13[%c0_52, %c0_53, %c0_54] : memref<1x3x32xf32, #tpu.memory_space<vmem>>, vector<1x3x32xf32>
    %137 = vector.shape_cast %136 : vector<1x3x32xf32> to vector<3x32xf32>
    %138 = vector.extract_strided_slice %135 {offsets = [0, 0], sizes = [32, 32], strides = [1, 1]} : vector<96x32xf32> to vector<32x32xf32>
    %cst_55 = arith.constant dense<0.000000e+00> : vector<8x32xf32>
    %139 = tpu.matmul %133, %138, %cst_55 {dimension_numbers = #tpu.dot_dimension_numbers<[1], [1], [0], [0], [0, 0, 1, 0], [], []>} : vector<8x32xf32>, vector<32x32xf32>, vector<8x32xf32> -> vector<8x32xf32>
    %140 = vector.extract_strided_slice %137 {offsets = [0, 0], sizes = [1, 32], strides = [1, 1]} : vector<3x32xf32> to vector<1x32xf32>
    %141 = vector.broadcast %140 : vector<1x32xf32> to vector<8x32xf32>
    %142 = arith.addf %139, %141 : vector<8x32xf32>
    %143 = vector.extract_strided_slice %135 {offsets = [32, 0], sizes = [32, 32], strides = [1, 1]} : vector<96x32xf32> to vector<32x32xf32>
    %cst_56 = arith.constant dense<0.000000e+00> : vector<8x32xf32>
    %144 = tpu.matmul %5, %143, %cst_56 {dimension_numbers = #tpu.dot_dimension_numbers<[1], [1], [0], [0], [0, 0, 1, 0], [], []>} : vector<8x32xf32>, vector<32x32xf32>, vector<8x32xf32> -> vector<8x32xf32>
    %145 = vector.extract_strided_slice %137 {offsets = [1, 0], sizes = [1, 32], strides = [1, 1]} : vector<3x32xf32> to vector<1x32xf32>
    %146 = vector.broadcast %145 : vector<1x32xf32> to vector<8x32xf32>
    %147 = arith.addf %144, %146 : vector<8x32xf32>
    %148 = vector.extract_strided_slice %135 {offsets = [64, 0], sizes = [32, 32], strides = [1, 1]} : vector<96x32xf32> to vector<32x32xf32>
    %cst_57 = arith.constant dense<0.000000e+00> : vector<8x32xf32>
    %149 = tpu.matmul %5, %148, %cst_57 {dimension_numbers = #tpu.dot_dimension_numbers<[1], [1], [0], [0], [0, 0, 1, 0], [], []>} : vector<8x32xf32>, vector<32x32xf32>, vector<8x32xf32> -> vector<8x32xf32>
    %150 = vector.extract_strided_slice %137 {offsets = [2, 0], sizes = [1, 32], strides = [1, 1]} : vector<3x32xf32> to vector<1x32xf32>
    %151 = vector.broadcast %150 : vector<1x32xf32> to vector<8x32xf32>
    %152 = arith.addf %149, %151 : vector<8x32xf32>
    %c0_58 = arith.constant 0 : index
    %c0_59 = arith.constant 0 : index
    %c0_60 = arith.constant 0 : index
    %153 = vector.load %arg14[%c0_58, %c0_59, %c0_60] : memref<1x32x32xf32, #tpu.memory_space<vmem>>, vector<1x32x32xf32>
    %154 = vector.shape_cast %153 : vector<1x32x32xf32> to vector<32x32xf32>
    %c0_61 = arith.constant 0 : index
    %c0_62 = arith.constant 0 : index
    %c0_63 = arith.constant 0 : index
    %155 = vector.load %arg15[%c0_61, %c0_62, %c0_63] : memref<1x1x32xf32, #tpu.memory_space<vmem>>, vector<1x1x32xf32>
    %156 = vector.shape_cast %155 : vector<1x1x32xf32> to vector<1x32xf32>
    %157 = vector.shape_cast %142 : vector<8x32xf32> to vector<1x8x32xf32>
    %158 = vector.shape_cast %147 : vector<8x32xf32> to vector<1x8x32xf32>
    %159 = vector.shape_cast %152 : vector<8x32xf32> to vector<1x8x32xf32>
    %160 = vector.extract_strided_slice %157 {offsets = [0, 0, 0], sizes = [1, 8, 8], strides = [1, 1, 1]} : vector<1x8x32xf32> to vector<1x8x8xf32>
    %161 = vector.extract_strided_slice %158 {offsets = [0, 0, 0], sizes = [1, 8, 8], strides = [1, 1, 1]} : vector<1x8x32xf32> to vector<1x8x8xf32>
    "tpu.trace_start"() <{level = 10 : i32, message = "bqd,bkd->bqk"}> : () -> ()
    %cst_64 = arith.constant dense<0.000000e+00> : vector<1x8x8xf32>
    %162 = tpu.matmul %160, %161, %cst_64 {dimension_numbers = #tpu.dot_dimension_numbers<[2], [2], [1], [1], [0, 0, 0, 1, 1, 1], [0], [0]>} : vector<1x8x8xf32>, vector<1x8x8xf32>, vector<1x8x8xf32> -> vector<1x8x8xf32>
    "tpu.trace_stop"() : () -> ()
    %163 = vector.broadcast %0 : vector<1x1x8xf32> to vector<1x8x8xf32>
    %164 = arith.addf %162, %163 : vector<1x8x8xf32>
    %cst_65 = arith.constant dense<0xFF800000> : vector<1x8xf32>
    %165 = vector.multi_reduction <maximumf>, %164, %cst_65 [2] : vector<1x8x8xf32> to vector<1x8xf32>
    %166 = vector.shape_cast %165 : vector<1x8xf32> to vector<1x8x1xf32>
    %167 = vector.broadcast %166 : vector<1x8x1xf32> to vector<1x8x8xf32>
    %168 = arith.subf %164, %167 : vector<1x8x8xf32>
    %169 = math.exp %168 : vector<1x8x8xf32>
    %cst_66 = arith.constant dense<0.000000e+00> : vector<1x8xf32>
    %170 = vector.multi_reduction <add>, %169, %cst_66 [2] : vector<1x8x8xf32> to vector<1x8xf32>
    %171 = vector.shape_cast %170 : vector<1x8xf32> to vector<1x8x1xf32>
    %172 = tpu.reciprocal %171 {approx = true} : vector<1x8x1xf32> -> vector<1x8x1xf32>
    %173 = vector.broadcast %172 : vector<1x8x1xf32> to vector<1x8x8xf32>
    %174 = arith.mulf %169, %173 : vector<1x8x8xf32>
    %175 = vector.extract_strided_slice %159 {offsets = [0, 0, 0], sizes = [1, 8, 8], strides = [1, 1, 1]} : vector<1x8x32xf32> to vector<1x8x8xf32>
    "tpu.trace_start"() <{level = 10 : i32, message = "bqk,bkd->bqd"}> : () -> ()
    %cst_67 = arith.constant dense<0.000000e+00> : vector<1x8x8xf32>
    %176 = tpu.matmul %174, %175, %cst_67 {dimension_numbers = #tpu.dot_dimension_numbers<[2], [1], [1], [2], [0, 0, 0, 1, 1, 2], [0], [0]>} : vector<1x8x8xf32>, vector<1x8x8xf32>, vector<1x8x8xf32> -> vector<1x8x8xf32>
    "tpu.trace_stop"() : () -> ()
    %177 = vector.extract_strided_slice %157 {offsets = [0, 0, 8], sizes = [1, 8, 8], strides = [1, 1, 1]} : vector<1x8x32xf32> to vector<1x8x8xf32>
    %178 = vector.extract_strided_slice %158 {offsets = [0, 0, 8], sizes = [1, 8, 8], strides = [1, 1, 1]} : vector<1x8x32xf32> to vector<1x8x8xf32>
    "tpu.trace_start"() <{level = 10 : i32, message = "bqd,bkd->bqk"}> : () -> ()
    %cst_68 = arith.constant dense<0.000000e+00> : vector<1x8x8xf32>
    %179 = tpu.matmul %177, %178, %cst_68 {dimension_numbers = #tpu.dot_dimension_numbers<[2], [2], [1], [1], [0, 0, 0, 1, 1, 1], [0], [0]>} : vector<1x8x8xf32>, vector<1x8x8xf32>, vector<1x8x8xf32> -> vector<1x8x8xf32>
    "tpu.trace_stop"() : () -> ()
    %180 = vector.broadcast %0 : vector<1x1x8xf32> to vector<1x8x8xf32>
    %181 = arith.addf %179, %180 : vector<1x8x8xf32>
    %cst_69 = arith.constant dense<0xFF800000> : vector<1x8xf32>
    %182 = vector.multi_reduction <maximumf>, %181, %cst_69 [2] : vector<1x8x8xf32> to vector<1x8xf32>
    %183 = vector.shape_cast %182 : vector<1x8xf32> to vector<1x8x1xf32>
    %184 = vector.broadcast %183 : vector<1x8x1xf32> to vector<1x8x8xf32>
    %185 = arith.subf %181, %184 : vector<1x8x8xf32>
    %186 = math.exp %185 : vector<1x8x8xf32>
    %cst_70 = arith.constant dense<0.000000e+00> : vector<1x8xf32>
    %187 = vector.multi_reduction <add>, %186, %cst_70 [2] : vector<1x8x8xf32> to vector<1x8xf32>
    %188 = vector.shape_cast %187 : vector<1x8xf32> to vector<1x8x1xf32>
    %189 = tpu.reciprocal %188 {approx = true} : vector<1x8x1xf32> -> vector<1x8x1xf32>
    %190 = vector.broadcast %189 : vector<1x8x1xf32> to vector<1x8x8xf32>
    %191 = arith.mulf %186, %190 : vector<1x8x8xf32>
    %192 = vector.extract_strided_slice %159 {offsets = [0, 0, 8], sizes = [1, 8, 8], strides = [1, 1, 1]} : vector<1x8x32xf32> to vector<1x8x8xf32>
    "tpu.trace_start"() <{level = 10 : i32, message = "bqk,bkd->bqd"}> : () -> ()
    %cst_71 = arith.constant dense<0.000000e+00> : vector<1x8x8xf32>
    %193 = tpu.matmul %191, %192, %cst_71 {dimension_numbers = #tpu.dot_dimension_numbers<[2], [1], [1], [2], [0, 0, 0, 1, 1, 2], [0], [0]>} : vector<1x8x8xf32>, vector<1x8x8xf32>, vector<1x8x8xf32> -> vector<1x8x8xf32>
    "tpu.trace_stop"() : () -> ()
    %194 = vector.extract_strided_slice %157 {offsets = [0, 0, 16], sizes = [1, 8, 8], strides = [1, 1, 1]} : vector<1x8x32xf32> to vector<1x8x8xf32>
    %195 = vector.extract_strided_slice %158 {offsets = [0, 0, 16], sizes = [1, 8, 8], strides = [1, 1, 1]} : vector<1x8x32xf32> to vector<1x8x8xf32>
    "tpu.trace_start"() <{level = 10 : i32, message = "bqd,bkd->bqk"}> : () -> ()
    %cst_72 = arith.constant dense<0.000000e+00> : vector<1x8x8xf32>
    %196 = tpu.matmul %194, %195, %cst_72 {dimension_numbers = #tpu.dot_dimension_numbers<[2], [2], [1], [1], [0, 0, 0, 1, 1, 1], [0], [0]>} : vector<1x8x8xf32>, vector<1x8x8xf32>, vector<1x8x8xf32> -> vector<1x8x8xf32>
    "tpu.trace_stop"() : () -> ()
    %197 = vector.broadcast %0 : vector<1x1x8xf32> to vector<1x8x8xf32>
    %198 = arith.addf %196, %197 : vector<1x8x8xf32>
    %cst_73 = arith.constant dense<0xFF800000> : vector<1x8xf32>
    %199 = vector.multi_reduction <maximumf>, %198, %cst_73 [2] : vector<1x8x8xf32> to vector<1x8xf32>
    %200 = vector.shape_cast %199 : vector<1x8xf32> to vector<1x8x1xf32>
    %201 = vector.broadcast %200 : vector<1x8x1xf32> to vector<1x8x8xf32>
    %202 = arith.subf %198, %201 : vector<1x8x8xf32>
    %203 = math.exp %202 : vector<1x8x8xf32>
    %cst_74 = arith.constant dense<0.000000e+00> : vector<1x8xf32>
    %204 = vector.multi_reduction <add>, %203, %cst_74 [2] : vector<1x8x8xf32> to vector<1x8xf32>
    %205 = vector.shape_cast %204 : vector<1x8xf32> to vector<1x8x1xf32>
    %206 = tpu.reciprocal %205 {approx = true} : vector<1x8x1xf32> -> vector<1x8x1xf32>
    %207 = vector.broadcast %206 : vector<1x8x1xf32> to vector<1x8x8xf32>
    %208 = arith.mulf %203, %207 : vector<1x8x8xf32>
    %209 = vector.extract_strided_slice %159 {offsets = [0, 0, 16], sizes = [1, 8, 8], strides = [1, 1, 1]} : vector<1x8x32xf32> to vector<1x8x8xf32>
    "tpu.trace_start"() <{level = 10 : i32, message = "bqk,bkd->bqd"}> : () -> ()
    %cst_75 = arith.constant dense<0.000000e+00> : vector<1x8x8xf32>
    %210 = tpu.matmul %208, %209, %cst_75 {dimension_numbers = #tpu.dot_dimension_numbers<[2], [1], [1], [2], [0, 0, 0, 1, 1, 2], [0], [0]>} : vector<1x8x8xf32>, vector<1x8x8xf32>, vector<1x8x8xf32> -> vector<1x8x8xf32>
    "tpu.trace_stop"() : () -> ()
    %211 = vector.extract_strided_slice %157 {offsets = [0, 0, 24], sizes = [1, 8, 8], strides = [1, 1, 1]} : vector<1x8x32xf32> to vector<1x8x8xf32>
    %212 = vector.extract_strided_slice %158 {offsets = [0, 0, 24], sizes = [1, 8, 8], strides = [1, 1, 1]} : vector<1x8x32xf32> to vector<1x8x8xf32>
    "tpu.trace_start"() <{level = 10 : i32, message = "bqd,bkd->bqk"}> : () -> ()
    %cst_76 = arith.constant dense<0.000000e+00> : vector<1x8x8xf32>
    %213 = tpu.matmul %211, %212, %cst_76 {dimension_numbers = #tpu.dot_dimension_numbers<[2], [2], [1], [1], [0, 0, 0, 1, 1, 1], [0], [0]>} : vector<1x8x8xf32>, vector<1x8x8xf32>, vector<1x8x8xf32> -> vector<1x8x8xf32>
    "tpu.trace_stop"() : () -> ()
    %214 = vector.broadcast %0 : vector<1x1x8xf32> to vector<1x8x8xf32>
    %215 = arith.addf %213, %214 : vector<1x8x8xf32>
    %cst_77 = arith.constant dense<0xFF800000> : vector<1x8xf32>
    %216 = vector.multi_reduction <maximumf>, %215, %cst_77 [2] : vector<1x8x8xf32> to vector<1x8xf32>
    %217 = vector.shape_cast %216 : vector<1x8xf32> to vector<1x8x1xf32>
    %218 = vector.broadcast %217 : vector<1x8x1xf32> to vector<1x8x8xf32>
    %219 = arith.subf %215, %218 : vector<1x8x8xf32>
    %220 = math.exp %219 : vector<1x8x8xf32>
    %cst_78 = arith.constant dense<0.000000e+00> : vector<1x8xf32>
    %221 = vector.multi_reduction <add>, %220, %cst_78 [2] : vector<1x8x8xf32> to vector<1x8xf32>
    %222 = vector.shape_cast %221 : vector<1x8xf32> to vector<1x8x1xf32>
    %223 = tpu.reciprocal %222 {approx = true} : vector<1x8x1xf32> -> vector<1x8x1xf32>
    %224 = vector.broadcast %223 : vector<1x8x1xf32> to vector<1x8x8xf32>
    %225 = arith.mulf %220, %224 : vector<1x8x8xf32>
    %226 = vector.extract_strided_slice %159 {offsets = [0, 0, 24], sizes = [1, 8, 8], strides = [1, 1, 1]} : vector<1x8x32xf32> to vector<1x8x8xf32>
    "tpu.trace_start"() <{level = 10 : i32, message = "bqk,bkd->bqd"}> : () -> ()
    %cst_79 = arith.constant dense<0.000000e+00> : vector<1x8x8xf32>
    %227 = tpu.matmul %225, %226, %cst_79 {dimension_numbers = #tpu.dot_dimension_numbers<[2], [1], [1], [2], [0, 0, 0, 1, 1, 2], [0], [0]>} : vector<1x8x8xf32>, vector<1x8x8xf32>, vector<1x8x8xf32> -> vector<1x8x8xf32>
    "tpu.trace_stop"() : () -> ()
    %228 = tpu.concatenate %176, %193, %210, %227 in 2 : vector<1x8x8xf32>, vector<1x8x8xf32>, vector<1x8x8xf32>, vector<1x8x8xf32> -> vector<1x8x32xf32>
    %229 = vector.shape_cast %228 : vector<1x8x32xf32> to vector<8x32xf32>
    %cst_80 = arith.constant dense<0.000000e+00> : vector<8x32xf32>
    %230 = tpu.matmul %229, %154, %cst_80 {dimension_numbers = #tpu.dot_dimension_numbers<[1], [1], [0], [0], [0, 0, 1, 0], [], []>} : vector<8x32xf32>, vector<32x32xf32>, vector<8x32xf32> -> vector<8x32xf32>
    %231 = vector.broadcast %156 : vector<1x32xf32> to vector<8x32xf32>
    %232 = arith.addf %230, %231 : vector<8x32xf32>
    %233 = arith.addf %133, %232 : vector<8x32xf32>
    %234 = vector.extract_strided_slice %7 {offsets = [1, 0], sizes = [1, 32], strides = [1, 1]} : vector<3x32xf32> to vector<1x32xf32>
    %235 = vector.extract_strided_slice %9 {offsets = [1, 0], sizes = [1, 32], strides = [1, 1]} : vector<3x32xf32> to vector<1x32xf32>
    %cst_81 = arith.constant dense<0.000000e+00> : vector<8xf32>
    %236 = vector.multi_reduction <add>, %233, %cst_81 [1] : vector<8x32xf32> to vector<8xf32>
    %237 = vector.shape_cast %236 : vector<8xf32> to vector<8x1xf32>
    %cst_82 = arith.constant 3.200000e+01 : f32
    %238 = vector.broadcast %cst_82 : f32 to vector<8x1xf32>
    %239 = arith.divf %237, %238 : vector<8x1xf32>
    %240 = vector.broadcast %239 : vector<8x1xf32> to vector<8x32xf32>
    %241 = arith.subf %233, %240 : vector<8x32xf32>
    %242 = arith.mulf %241, %241 : vector<8x32xf32>
    %cst_83 = arith.constant dense<0.000000e+00> : vector<8xf32>
    %243 = vector.multi_reduction <add>, %242, %cst_83 [1] : vector<8x32xf32> to vector<8xf32>
    %244 = vector.shape_cast %243 : vector<8xf32> to vector<8x1xf32>
    %cst_84 = arith.constant 3.200000e+01 : f32
    %245 = vector.broadcast %cst_84 : f32 to vector<8x1xf32>
    %246 = arith.divf %244, %245 : vector<8x1xf32>
    %247 = vector.broadcast %239 : vector<8x1xf32> to vector<8x32xf32>
    %248 = arith.subf %233, %247 : vector<8x32xf32>
    %cst_85 = arith.constant 9.99999974E-6 : f32
    %249 = vector.broadcast %cst_85 : f32 to vector<8x1xf32>
    %250 = arith.addf %246, %249 : vector<8x1xf32>
    %251 = math.rsqrt %250 : vector<8x1xf32>
    %252 = vector.broadcast %251 : vector<8x1xf32> to vector<8x32xf32>
    %253 = arith.mulf %248, %252 : vector<8x32xf32>
    %254 = vector.broadcast %234 : vector<1x32xf32> to vector<8x32xf32>
    %255 = arith.mulf %253, %254 : vector<8x32xf32>
    %256 = vector.broadcast %235 : vector<1x32xf32> to vector<8x32xf32>
    %257 = arith.addf %255, %256 : vector<8x32xf32>
    %c0_86 = arith.constant 0 : index
    %c0_87 = arith.constant 0 : index
    %c0_88 = arith.constant 0 : index
    %258 = vector.load %arg16[%c0_86, %c0_87, %c0_88] : memref<1x64x32xf32, #tpu.memory_space<vmem>>, vector<1x64x32xf32>
    %259 = vector.shape_cast %258 : vector<1x64x32xf32> to vector<64x32xf32>
    %cst_89 = arith.constant dense<0.000000e+00> : vector<8x64xf32>
    %260 = tpu.matmul %257, %259, %cst_89 {dimension_numbers = #tpu.dot_dimension_numbers<[1], [1], [0], [0], [0, 0, 1, 0], [], []>} : vector<8x32xf32>, vector<64x32xf32>, vector<8x64xf32> -> vector<8x64xf32>
    %c0_90 = arith.constant 0 : index
    %c0_91 = arith.constant 0 : index
    %c0_92 = arith.constant 0 : index
    %261 = vector.load %arg17[%c0_90, %c0_91, %c0_92] : memref<1x1x64xf32, #tpu.memory_space<vmem>>, vector<1x1x64xf32>
    %262 = vector.shape_cast %261 : vector<1x1x64xf32> to vector<1x64xf32>
    %263 = vector.broadcast %262 : vector<1x64xf32> to vector<8x64xf32>
    %264 = arith.addf %260, %263 : vector<8x64xf32>
    %cst_93 = arith.constant 0.000000e+00 : f32
    %265 = vector.broadcast %cst_93 : f32 to vector<8x64xf32>
    %266 = arith.maximumf %264, %265 : vector<8x64xf32>
    %c0_94 = arith.constant 0 : index
    %c0_95 = arith.constant 0 : index
    %c0_96 = arith.constant 0 : index
    %267 = vector.load %arg18[%c0_94, %c0_95, %c0_96] : memref<1x32x64xf32, #tpu.memory_space<vmem>>, vector<1x32x64xf32>
    %268 = vector.shape_cast %267 : vector<1x32x64xf32> to vector<32x64xf32>
    %cst_97 = arith.constant dense<0.000000e+00> : vector<8x32xf32>
    %269 = tpu.matmul %266, %268, %cst_97 {dimension_numbers = #tpu.dot_dimension_numbers<[1], [1], [0], [0], [0, 0, 1, 0], [], []>} : vector<8x64xf32>, vector<32x64xf32>, vector<8x32xf32> -> vector<8x32xf32>
    %c0_98 = arith.constant 0 : index
    %c0_99 = arith.constant 0 : index
    %c0_100 = arith.constant 0 : index
    %270 = vector.load %arg19[%c0_98, %c0_99, %c0_100] : memref<1x1x32xf32, #tpu.memory_space<vmem>>, vector<1x1x32xf32>
    %271 = vector.shape_cast %270 : vector<1x1x32xf32> to vector<1x32xf32>
    %272 = vector.broadcast %271 : vector<1x32xf32> to vector<8x32xf32>
    %273 = arith.addf %269, %272 : vector<8x32xf32>
    %274 = arith.addf %257, %273 : vector<8x32xf32>
    %275 = vector.extract_strided_slice %7 {offsets = [2, 0], sizes = [1, 32], strides = [1, 1]} : vector<3x32xf32> to vector<1x32xf32>
    %276 = vector.extract_strided_slice %9 {offsets = [2, 0], sizes = [1, 32], strides = [1, 1]} : vector<3x32xf32> to vector<1x32xf32>
    %cst_101 = arith.constant dense<0.000000e+00> : vector<8xf32>
    %277 = vector.multi_reduction <add>, %274, %cst_101 [1] : vector<8x32xf32> to vector<8xf32>
    %278 = vector.shape_cast %277 : vector<8xf32> to vector<8x1xf32>
    %cst_102 = arith.constant 3.200000e+01 : f32
    %279 = vector.broadcast %cst_102 : f32 to vector<8x1xf32>
    %280 = arith.divf %278, %279 : vector<8x1xf32>
    %281 = vector.broadcast %280 : vector<8x1xf32> to vector<8x32xf32>
    %282 = arith.subf %274, %281 : vector<8x32xf32>
    %283 = arith.mulf %282, %282 : vector<8x32xf32>
    %cst_103 = arith.constant dense<0.000000e+00> : vector<8xf32>
    %284 = vector.multi_reduction <add>, %283, %cst_103 [1] : vector<8x32xf32> to vector<8xf32>
    %285 = vector.shape_cast %284 : vector<8xf32> to vector<8x1xf32>
    %cst_104 = arith.constant 3.200000e+01 : f32
    %286 = vector.broadcast %cst_104 : f32 to vector<8x1xf32>
    %287 = arith.divf %285, %286 : vector<8x1xf32>
    %288 = vector.broadcast %280 : vector<8x1xf32> to vector<8x32xf32>
    %289 = arith.subf %274, %288 : vector<8x32xf32>
    %cst_105 = arith.constant 9.99999974E-6 : f32
    %290 = vector.broadcast %cst_105 : f32 to vector<8x1xf32>
    %291 = arith.addf %287, %290 : vector<8x1xf32>
    %292 = math.rsqrt %291 : vector<8x1xf32>
    %293 = vector.broadcast %292 : vector<8x1xf32> to vector<8x32xf32>
    %294 = arith.mulf %289, %293 : vector<8x32xf32>
    %295 = vector.broadcast %275 : vector<1x32xf32> to vector<8x32xf32>
    %296 = arith.mulf %294, %295 : vector<8x32xf32>
    %297 = vector.broadcast %276 : vector<1x32xf32> to vector<8x32xf32>
    %298 = arith.addf %296, %297 : vector<8x32xf32>
    %c0_106 = arith.constant 0 : index
    %c0_107 = arith.constant 0 : index
    %299 = vector.load %arg24[%c0_106, %c0_107] : memref<8x32xf32, #tpu.memory_space<vmem>>, vector<8x32xf32>
    tpu.vector_store %arg24[%c0_106, %c0_107], %298 {strides = array<i32>} : memref<8x32xf32, #tpu.memory_space<vmem>>, vector<8x32xf32>,
    %c1_i32 = arith.constant 1 : i32
    %300 = arith.cmpi eq, %arg1, %c1_i32 : i32
    %301 = arith.extui %300 : i1 to i32
    %c0_i32_108 = arith.constant 0 : i32
    %302 = arith.cmpi ne, %301, %c0_i32_108 : i32
    scf.if %302 {
      %303 = vector.shape_cast %298 : vector<8x32xf32> to vector<1x8x32xf32>
      %c0_109 = arith.constant 0 : index
      %c0_110 = arith.constant 0 : index
      %c0_111 = arith.constant 0 : index
      %304 = vector.load %arg22[%c0_109, %c0_110, %c0_111] : memref<1x8x32xf32, #tpu.memory_space<vmem>>, vector<1x8x32xf32>
      tpu.vector_store %arg22[%c0_109, %c0_110, %c0_111], %303 {strides = array<i32>} : memref<1x8x32xf32, #tpu.memory_space<vmem>>, vector<1x8x32xf32>,
      %c0_112 = arith.constant 0 : index
      %c0_113 = arith.constant 0 : index
      %305 = vector.load %arg6[%c0_112, %c0_113] : memref<8x32xf32, #tpu.memory_space<vmem>>, vector<8x32xf32>
      %cst_114 = arith.constant dense<0.000000e+00> : vector<8x8xf32>
      %306 = tpu.matmul %298, %305, %cst_114 {dimension_numbers = #tpu.dot_dimension_numbers<[1], [1], [0], [0], [0, 0, 1, 0], [], []>} : vector<8x32xf32>, vector<8x32xf32>, vector<8x8xf32> -> vector<8x8xf32>
      %c0_115 = arith.constant 0 : index
      %c0_116 = arith.constant 0 : index
      %307 = vector.load %arg7[%c0_115, %c0_116] : memref<1x8xf32, #tpu.memory_space<vmem>>, vector<1x8xf32>
      %308 = vector.broadcast %307 : vector<1x8xf32> to vector<8x8xf32>
      %309 = arith.addf %306, %308 : vector<8x8xf32>
      %310 = vector.shape_cast %309 : vector<8x8xf32> to vector<1x8x8xf32>
      %c0_117 = arith.constant 0 : index
      %c0_118 = arith.constant 0 : index
      %c0_119 = arith.constant 0 : index
      %311 = vector.load %arg23[%c0_117, %c0_118, %c0_119] : memref<1x8x8xf32, #tpu.memory_space<vmem>>, vector<1x8x8xf32>
      tpu.vector_store %arg23[%c0_117, %c0_118, %c0_119], %310 {strides = array<i32>} : memref<1x8x8xf32, #tpu.memory_space<vmem>>, vector<1x8x8xf32>,
    } else {
    }
    return
  }
  func.func @transform_0(%arg0: i32, %arg1: i32) -> (i32, i32, i32) {
    %c0_i32 = arith.constant 0 : i32
    %c0_i32_0 = arith.constant 0 : i32
    %c0_i32_1 = arith.constant 0 : i32
    return %arg0, %c0_i32, %c0_i32_0 : i32, i32, i32
  }
  func.func @transform_1(%arg0: i32, %arg1: i32) -> (i32, i32, i32) {
    %c0_i32 = arith.constant 0 : i32
    %c0_i32_0 = arith.constant 0 : i32
    %c0_i32_1 = arith.constant 0 : i32
    return %arg0, %c0_i32, %c0_i32_0 : i32, i32, i32
  }
  func.func @transform_2(%arg0: i32, %arg1: i32) -> (i32, i32) {
    %c0_i32 = arith.constant 0 : i32
    %c0_i32_0 = arith.constant 0 : i32
    %c0_i32_1 = arith.constant 0 : i32
    return %c0_i32, %c0_i32_0 : i32, i32
  }
  func.func @transform_3(%arg0: i32, %arg1: i32) -> (i32, i32) {
    %c0_i32 = arith.constant 0 : i32
    %c0_i32_0 = arith.constant 0 : i32
    %c0_i32_1 = arith.constant 0 : i32
    return %c0_i32, %c0_i32_0 : i32, i32
  }
  func.func @transform_4(%arg0: i32, %arg1: i32) -> (i32, i32) {
    %c0_i32 = arith.constant 0 : i32
    %c0_i32_0 = arith.constant 0 : i32
    %c0_i32_1 = arith.constant 0 : i32
    return %c0_i32, %c0_i32_0 : i32, i32
  }
  func.func @transform_5(%arg0: i32, %arg1: i32) -> (i32, i32) {
    %c0_i32 = arith.constant 0 : i32
    %c0_i32_0 = arith.constant 0 : i32
    %c0_i32_1 = arith.constant 0 : i32
    return %c0_i32, %c0_i32_0 : i32, i32
  }
  func.func @transform_6(%arg0: i32, %arg1: i32) -> (i32, i32, i32) {
    %c0_i32 = arith.constant 0 : i32
    %c0_i32_0 = arith.constant 0 : i32
    %c0_i32_1 = arith.constant 0 : i32
    return %arg1, %c0_i32, %c0_i32_0 : i32, i32, i32
  }
  func.func @transform_7(%arg0: i32, %arg1: i32) -> (i32, i32, i32) {
    %c0_i32 = arith.constant 0 : i32
    %c0_i32_0 = arith.constant 0 : i32
    %c0_i32_1 = arith.constant 0 : i32
    return %arg1, %c0_i32, %c0_i32_0 : i32, i32, i32
  }
  func.func @transform_8(%arg0: i32, %arg1: i32) -> (i32, i32, i32) {
    %c0_i32 = arith.constant 0 : i32
    %c0_i32_0 = arith.constant 0 : i32
    %c0_i32_1 = arith.constant 0 : i32
    return %arg1, %c0_i32, %c0_i32_0 : i32, i32, i32
  }
  func.func @transform_9(%arg0: i32, %arg1: i32) -> (i32, i32, i32) {
    %c0_i32 = arith.constant 0 : i32
    %c0_i32_0 = arith.constant 0 : i32
    %c0_i32_1 = arith.constant 0 : i32
    return %arg1, %c0_i32, %c0_i32_0 : i32, i32, i32
  }
  func.func @transform_10(%arg0: i32, %arg1: i32) -> (i32, i32, i32) {
    %c0_i32 = arith.constant 0 : i32
    %c0_i32_0 = arith.constant 0 : i32
    %c0_i32_1 = arith.constant 0 : i32
    return %arg1, %c0_i32, %c0_i32_0 : i32, i32, i32
  }
  func.func @transform_11(%arg0: i32, %arg1: i32) -> (i32, i32, i32) {
    %c0_i32 = arith.constant 0 : i32
    %c0_i32_0 = arith.constant 0 : i32
    %c0_i32_1 = arith.constant 0 : i32
    return %arg1, %c0_i32, %c0_i32_0 : i32, i32, i32
  }
  func.func @transform_12(%arg0: i32, %arg1: i32) -> (i32, i32, i32) {
    %c0_i32 = arith.constant 0 : i32
    %c0_i32_0 = arith.constant 0 : i32
    %c0_i32_1 = arith.constant 0 : i32
    return %arg1, %c0_i32, %c0_i32_0 : i32, i32, i32
  }
  func.func @transform_13(%arg0: i32, %arg1: i32) -> (i32, i32, i32) {
    %c0_i32 = arith.constant 0 : i32
    %c0_i32_0 = arith.constant 0 : i32
    %c0_i32_1 = arith.constant 0 : i32
    return %arg1, %c0_i32, %c0_i32_0 : i32, i32, i32
  }
  func.func @transform_14(%arg0: i32, %arg1: i32) -> (i32, i32, i32) {
    %c0_i32 = arith.constant 0 : i32
    %c0_i32_0 = arith.constant 0 : i32
    %c0_i32_1 = arith.constant 0 : i32
    return %arg1, %c0_i32, %c0_i32_0 : i32, i32, i32
  }
  func.func @transform_15(%arg0: i32, %arg1: i32) -> (i32, i32, i32) {
    %c0_i32 = arith.constant 0 : i32
    %c0_i32_0 = arith.constant 0 : i32
    %c0_i32_1 = arith.constant 0 : i32
    return %arg1, %c0_i32, %c0_i32_0 : i32, i32, i32
  }
  func.func @transform_16(%arg0: i32, %arg1: i32) -> (i32, i32, i32) {
    %c0_i32 = arith.constant 0 : i32
    %c0_i32_0 = arith.constant 0 : i32
    %c0_i32_1 = arith.constant 0 : i32
    return %arg1, %c0_i32, %c0_i32_0 : i32, i32, i32
  }
  func.func @transform_17(%arg0: i32, %arg1: i32) -> (i32, i32, i32) {
    %c0_i32 = arith.constant 0 : i32
    %c0_i32_0 = arith.constant 0 : i32
    %c0_i32_1 = arith.constant 0 : i32
    return %arg1, %c0_i32, %c0_i32_0 : i32, i32, i32
  }
  func.func @transform_18(%arg0: i32, %arg1: i32) -> (i32, i32, i32) {
    %c0_i32 = arith.constant 0 : i32
    %c0_i32_0 = arith.constant 0 : i32
    %c0_i32_1 = arith.constant 0 : i32
    return %arg1, %c0_i32, %c0_i32_0 : i32, i32, i32
  }
  func.func @transform_19(%arg0: i32, %arg1: i32) -> (i32, i32, i32) {
    %c0_i32 = arith.constant 0 : i32
    %c0_i32_0 = arith.constant 0 : i32
    %c0_i32_1 = arith.constant 0 : i32
    return %arg1, %c0_i32, %c0_i32_0 : i32, i32, i32
  }
  func.func @transform_20(%arg0: i32, %arg1: i32) -> (i32, i32, i32) {
    %c0_i32 = arith.constant 0 : i32
    %c0_i32_0 = arith.constant 0 : i32
    %c0_i32_1 = arith.constant 0 : i32
    return %arg0, %c0_i32, %c0_i32_0 : i32, i32, i32
  }
  func.func @transform_21(%arg0: i32, %arg1: i32) -> (i32, i32, i32) {
    %c0_i32 = arith.constant 0 : i32
    %c0_i32_0 = arith.constant 0 : i32
    %c0_i32_1 = arith.constant 0 : i32
    return %arg0, %c0_i32, %c0_i32_0 : i32, i32, i32
  }
}

</mosaic_0001>

<bundles_post_ra>
// kernel: tpu_custom_call.1
= control target key start
LH: loop header
LB: loop body
LE: loop exit
PB: predicated region body
PF: predicated region fallthrough
CT: control target
= control target key end

     0   :  { %s5382_s0 = inlined_call_operand.vmem [shape: f32[2,8,8], index: 0, kind: input, shape index: {}]   ;;  %s5383_s1 = inlined_call_operand.vmem [shape: f32[2,1,8], index: 1, kind: input, shape index: {}]   ;;  %s5384_s2 = inlined_call_operand.vmem [shape: f32[8,32], index: 2, kind: input, shape index: {}]   ;;  %s5385_s3 = inlined_call_operand.vmem [shape: f32[32,8], index: 3, kind: input, shape index: {}]   ;;  %s5386_s4 = inlined_call_operand.vmem [shape: f32[8,32], index: 4, kind: input, shape index: {}]   ;;  %s5387_s5 = inlined_call_operand.vmem [shape: f32[1,8], index: 5, kind: input, shape index: {}]   ;;  %s5388_s6 = inlined_call_operand.vmem [shape: f32[2,96,32], index: 6, kind: input, shape index: {}]   ;;  %s5389_s7 = inlined_call_operand.vmem [shape: f32[2,3,32], index: 7, kind: input, shape index: {}]   ;;  %s5390_s8 = inlined_call_operand.vmem [shape: f32[2,32,32], index: 8, kind: input, shape index: {}]   ;;  %s5391_s9 = inlined_call_operand.vmem [shape: f32[2,1,32], index: 9, kind: input, shape index: {}]   ;;  %s5392_s10 = inlined_call_operand.vmem [shape: f32[2,96,32], index: 10, kind: input, shape index: {}]   ;;  %s5393_s11 = inlined_call_operand.vmem [shape: f32[2,3,32], index: 11, kind: input, shape index: {}]   ;;  %s5394_s12 = inlined_call_operand.vmem [shape: f32[2,32,32], index: 12, kind: input, shape index: {}]   ;;  %s5395_s13 = inlined_call_operand.vmem [shape: f32[2,1,32], index: 13, kind: input, shape index: {}]   ;;  %s5396_s14 = inlined_call_operand.vmem [shape: f32[2,64,32], index: 14, kind: input, shape index: {}]   ;;  %s5397_s15 = inlined_call_operand.vmem [shape: f32[2,1,64], index: 15, kind: input, shape index: {}]   ;;  %s5398_s16 = inlined_call_operand.vmem [shape: f32[2,32,64], index: 16, kind: input, shape index: {}]   ;;  %s5399_s17 = inlined_call_operand.vmem [shape: f32[2,1,32], index: 17, kind: input, shape index: {}]   ;;  %s5400_s18 = inlined_call_operand.vmem [shape: f32[2,3,32], index: 18, kind: input, shape index: {}]   ;;  %s5401_s19 = inlined_call_operand.vmem [shape: f32[2,3,32], index: 19, kind: input, shape index: {}]   ;;  %s5402_s20 = inlined_call_operand.hbm [shape: f32[2,8,32], index: 20, kind: output, shape index: {0}]   ;;  %s5403_s21 = inlined_call_operand.hbm [shape: f32[2,8,8], index: 21, kind: output, shape index: {1}]  }
   0x1   :  { %5424 = sst [smem:[#allocation25_spill]] %s5382_s0 }
   0x2   :  { %5425 = sst [smem:[#allocation26_spill]] %s5383_s1 }
   0x3   :  { %5426 = sst [smem:[#allocation27_spill]] %s5384_s2 }
   0x4   :  { %5427 = sst [smem:[#allocation28_spill]] %s5385_s3 }
   0x5   :  { %5428 = sst [smem:[#allocation29_spill]] %s5386_s4 }
   0x6   :  { %5429 = sst [smem:[#allocation30_spill]] %s5387_s5 }
   0x7   :  { %5430 = sst [smem:[#allocation31_spill]] %s5388_s6 }
   0x8   :  { %5431 = sst [smem:[#allocation32_spill]] %s5390_s8 }
   0x9   :  { %5432 = sst [smem:[#allocation33_spill]] %s5392_s10 }
   0xa   :  { %5433 = sst [smem:[#allocation34_spill]] %s5393_s11 }
   0xb   :  { %5434 = sst [smem:[#allocation35_spill]] %s5394_s12 }
   0xc   :  { %5435 = sst [smem:[#allocation36_spill]] %s5395_s13 }
   0xd   :  { %5436 = sst [smem:[#allocation37_spill]] %s5397_s15 }
   0xe   :  { %5437 = sst [smem:[#allocation38_spill]] %s5398_s16 }
   0xf   :  { %5438 = sst [smem:[#allocation39_spill]] %s5399_s17 }
  0x10   :  { %5439 = sst [smem:[#allocation40_spill]] %s5400_s18 }
  0x11   :  { %5440 = sst [smem:[#allocation41_spill]] %s5401_s19 }
  0x12   :  { %5441 = sst [smem:[#allocation42_spill]] %s5402_s20 }
  0x13   :  { %5442 = sst [smem:[#allocation43_spill]] %s5403_s21 }
  0x14   :  { %27 = vsyncpa [#allocation5], 0 }
  0x15   :  { %29 = vsyncpa [#allocation5 + $0x1], 0 }
  0x16   :  { %30 = vsyncpa [#allocation7], 0 }
  0x17   :  { %32 = vsyncpa [#allocation7 + $0x1], 0  ;;  %s4731_s2 = smov 0   ;;  %s4733_s25 = smov 0  }
  0x18   :  { %s4735_s26 = smov 0   ;;  %s4737_s27 = smov 0  }
  0x19   :  { %s4739_s3 = smov 0   ;;  %s4741_s28 = smov 0  }
  0x1a   :  { %s4743_s29 = smov 0   ;;  %s4745_s0 = smov 0  }
  0x1b LB: > { %5443 = sst [smem:[#allocation10_spill]] %s4575_s2  ;;  %s3816_s4 = sadd.s32 4294967295, %s4603_s0   ;;  %s4603_s0 = sphi %s4745_s0, %s38_s0   ;;  %s4599_s29 = sphi %s4743_s29, %s5510_s29   ;;  %s4595_s28 = sphi %s4741_s28, %s5509_s28   ;;  %s4591_s3 = sphi %s4739_s3, %s5508_s3   ;;  %s4587_s27 = sphi %s4737_s27, %s5507_s27   ;;  %s4583_s26 = sphi %s4735_s26, %s5506_s26   ;;  %s4579_s25 = sphi %s4733_s25, %s5505_s25   ;;  %s4575_s2 = sphi %s4731_s2, %s5504_s2  }
  0x1c   : > { %5444 = sst [smem:[#allocation11_spill]] %s4579_s25  ;;  %s3817_s30 = sadd.s32 4294967294, %s4603_s0  }
  0x1d   : > { %5445 = sst [smem:[#allocation12_spill]] %s4583_s26  ;;  %s47_s5 = sadd.s32 1, %s4595_s28 }
  0x1e   : > { %5446 = sst [smem:[#allocation13_spill]] %s4587_s27  ;;  %p48_p0 = scmp.ge.s32.totalorder %s47_s5, 2 }
  0x1f   : > { %5447 = sst [smem:[#allocation14_spill]] %s4591_s3  ;;  %s50_s22 = sadd.s32 1, %s4599_s29 }
  0x20   : > { %5448 = sst [smem:[#allocation15_spill]] %s4595_s28  ;;  %p567_p1 = scmp.ne.s32.totalorder %s4583_s26, %s4579_s25 }
  0x21   : > { %5449 = sst [smem:[#allocation16_spill]] %s4599_s29  ;;  %p568_p2 = scmp.eq.s32.totalorder %s3816_s4, 3 }
  0x22   : > { %5450 = sst [smem:[#allocation17_spill]] %s4603_s0  ;;  %s5512_s5 = smov (%p48_p0, %s47_s5), 0 }
  0x23   : > { %5451 = sst [smem:[#allocation18_spill]] %s5512_s5  ;;  %s5514_s22 = smov (!%p48_p0, %s50_s22), %s4599_s29 }
  0x24   : > { %p4780_p3 = por %p568_p2, %p567_p1  ;;  %p573_p4 = scmp.ne.s32.totalorder %s4579_s25, %s4575_s2 }
  0x25   : > { %p52_p5 = scmp.ge.s32.totalorder %s5514_s22, 2  ;;  %p574_p6 = scmp.eq.s32.totalorder %s3817_s30, 3 }
  0x26   : > { %s5452_s23 = scalar_select %p4780_p3, 1, 0 }
  0x27   : > { %p3820_p7 = scmp.ge.s32.totalorder %s4603_s0, 1  ;;  %p743_p8 = scmp.lt.s32.totalorder %s4603_s0, 5 }
  0x28   : > { %5453 = sst [smem:[#allocation19_spill]] %s5452_s23  ;;  %s5516_s22 = smov (%p52_p5, %s5514_s22), 0 }
  0x29   : > { %5454 = sst [smem:[#allocation20_spill]] %s5516_s22  ;;  %p4790_p9 = por %p574_p6, %p573_p4 }
  0x2a   : > { %p744_p10 = pnand %p3820_p7, %p743_p8  ;;  %s554_s24 = ssub.s32 %s4599_s29, %s5516_s22 }
  0x2b   : > { %s5455_s1 = scalar_select %p4790_p9, 1, 0 }
  0x2c   : > { %s557_s4 = sadd.s32 1, %s4583_s26  ;;  %p555_p11 = scmp.eq.s32.totalorder %s554_s24, 0 }
  0x2d   : > { %5456 = sst [smem:[#allocation21_spill]] %s5455_s1  ;;  %747 = sbr.rel (%p744_p10) target bundleno = 5601 (0x15e1), region = 100 }
  0x2e   : > { %s4798_s5 = scalar_select %p555_p11, %s4583_s26, %s557_s4  }
  0x30   : > { %5457 = sst [smem:[#allocation22_spill]] %s4798_s5 }
  0x34   : > { %s4801_s30 = sand.u32 1, %s4579_s25   ;;  %p868_p12 = scmp.lt.s32.totalorder %s4591_s3, 1 }
  0x35   : > { %5458 = sst [smem:[#allocation23_spill]] %s4801_s30  ;;  %s3821_s28 = sshll.u32 %s4801_s30, 3 }
  0x36   : > { %p875_p13 = scmp.lt.s32.totalorder %s4587_s27, 1  ;;  %s5459_s29 = sld [smem:[#allocation26_spill]] }
  0x37   : > { %s869_s2 = scalar_select %p868_p12, %s4591_s3, 1 }
  0x38   : > { %s4808_s1 = scalar_select %p875_p13, %s4587_s27, 1 }
  0x39   : > { %s3823_s24 = sshll.u32 %s869_s2, 3  ;;  %s5460_s0 = sld [smem:[#allocation25_spill]] }
  0x3a   : > { %s4344_s20 = smul.u32 96, %s4808_s1  ;;  %s4820_s23 = sshll.u32 %s4808_s1, 2 }
  0x3b   : > { %s3937_s30 = sshll.u32 %s4808_s1, 5  ;;  %s5461_s6 = sld [smem:[#allocation31_spill]] }
  0x3c   : > { %s874_s5 = scalar_lea.vmem %s5459_s29, %s869_s2  ;;  %s5462_s8 = sld [smem:[#allocation32_spill]] }
  0x3d   : > { %v4817_v0 = vld [vmem:[%s874_s5] ss:$0 sm:$0xff]  ;;  %s5463_s10 = sld [smem:[#allocation33_spill]]  ;;  %s5465_s12 = sld [smem:[#allocation35_spill]] }
  0x3e   : > { %s5471_s13 = sld [smem:[#allocation40_spill]]  ;;  %s5472_s17 = sld [smem:[#allocation41_spill]] }
  0x3f   : > { %s871_s21 = scalar_lea.vmem %s5460_s0, %s3823_s24  ;;  %s3939_s24 = sshll.u32 %s4808_s1, 6 }
  0x40   : > { %s4886_s18 = scalar_lea.vmem [#allocation4], %s3821_s28 }
  0x41   : > { %s4826_s22 = scalar_lea.vmem %s5461_s6, %s4344_s20  ;;  %s5469_s6 = sld [smem:[#allocation38_spill]] }
  0x42   : > { %s4835_s5 = scalar_lea.vmem %s5462_s8, %s3937_s30 }
  0x43   : > { %s4844_s16 = scalar_lea.vmem %s5463_s10, %s4344_s20  ;;  %s4853_s25 = scalar_lea.vmem %s5465_s12, %s3937_s30 }
  0x44   : > { %5466 = sst [smem:[#allocation24_spill]] %s4853_s25  ;;  %s4867_s10 = scalar_lea.vmem %s5396_s14, %s3939_s24 }
  0x45   : > { %s5470_s25 = sld [smem:[#allocation39_spill]]  ;;  %s928_s11 = scalar_lea.vmem %s5471_s13, %s4820_s23 }
  0x46   : > { %s932_s15 = scalar_lea.vmem %s5472_s17, %s4820_s23  ;;  %s4888_s24 = scalar_lea.vmem [#allocation6], %s3821_s28 }
  0x47   : > { %s4872_s2 = scalar_lea.vmem %s5469_s6, %s3937_s30  ;;  %s5473_s20 = sld [smem:[#allocation13_spill]] }
  0x4b   : > { %s924_s26 = scalar_lea.vmem %s5470_s25, %s4808_s1 }
  0x4d   : > { %p3838_p0 = scmp.ne.s32.totalorder %s5473_s20, 0 }
  0x4e   : > { %v938_v1 = vld [vmem:[%s871_s21] sm:$0xff] (!%p3838_p0)  ;;  %vm939_vm0 = vcmask (!%p3838_p0), 64512   ;;  %s5474_s8 = sld [smem:[#allocation28_spill]] (!%p3838_p0)  ;;  %v4605_v6 = vmov (!%p3838_p0), 0.0|0.0   ;;  %vm4606_vm2 = vmmov (!%p3838_p0), 0   ;;  %v4607_v16 = vmov (!%p3838_p0), 0.0  }
  0x4f   : > { %937 = sbr.rel (%p3838_p0) target bundleno = 608 (0x260), region = 104  ;;  %v940_v2 = vsel (!%p3838_p0), %vm939_vm0, %v938_v1, -inf  ;;  %vm4900_vm1 = vmpackc.low (!%p3838_p0), %vm939_vm0, %vm939_vm0  ;;  %4248 = vmatprep.subr.bf16.mxu0 (!%p3838_p0), %v4605_v6  ;;  %4042 = vmatprep.mubr.msk.f32.mxu0 (!%p3838_p0), %vm4606_vm2, %v4607_v16  ;;  %s5477_s29 = sld [smem:[#allocation27_spill]] (!%p3838_p0)  ;;  %vm1041_vm3 = vcmask (!%p3838_p0), 261120  }
  0x50   : > { %941 = vmax.xlane.f32.xlu0 (!%p3838_p0), %v940_v2 }
  0x54   : > { %v952_v3 = vld [vmem:[%s5474_s8] sm:$0xff] (!%p3838_p0)  ;;  %v953_v4 = vld [vmem:[%s5474_s8 + $0x8] sm:$0xff] (!%p3838_p0)  ;;  %v954_v13 = vld [vmem:[%s5474_s8 + $0x10] sm:$0xff] (!%p3838_p0) }
  0x55   : > { %v4249_v7 = vpack.c.bf16 (!%p3838_p0), %v953_v4, %v952_v3  ;;  %v955_v14 = vld [vmem:[%s5474_s8 + $0x18] sm:$0xff] (!%p3838_p0)  ;;  %v951_v20 = vld [vmem:[%s5477_s29] sm:$0xff] (!%p3838_p0) }
  0x56   : > { %v4253_v15 = vpack.c.bf16 %v955_v14, %v954_v13  ;;  %1043 = vst.msk [vmem:[#allocation2] sm:$0xff] %vm1041_vm3, %v951_v20 }
  0x57   : > { %4251 = vmatpush3.bf16.xpose.msk.msra.mxu0 %vm4900_vm1, %v4249_v7 }
  0x58   : > { %4252 = vmatprep.subr.bf16.mxu0 %v4605_v6 }
  0x5f   : > { %4255 = vmatpush3.bf16.xpose.msk.msra.mxu0 %vm4900_vm1, %v4253_v15 }
  0xdd   : > { %v942_v8 = vpop.xlane.xlu0 %941 }
  0xde   : > { %v943_v9 = vsub.f32 %v938_v1, %v942_v8 }
  0xe0   : > { %v944_v10 = vmul.f32 1.442695, %v943_v9 }
  0xe2   : > { %4435 = vpow2.f32 %v944_v10 }
  0xec   : > { %v4436_v11 = vpop.eup %4435 }
  0xed   : > { %v946_v12 = vsel %vm939_vm0, %v4436_v11, 0.0 }
  0xee   : > { %947 = vadd.xlane.f32.xlu0 %v946_v12 }
 0x17b   : > { %v948_v17 = vpop.xlane.xlu0 %947 }
 0x17c   : > { %4437 = vrcp.f32 %v948_v17 }
 0x186   : > { %v4438_v18 = vpop.eup %4437 }
 0x187   : > { %v950_v19 = vmul.f32 %v4438_v18, %v4436_v11 }
 0x189   : > { %4043 = vmatmul.mubr.msk.f32.vlgmr.msra.gmra.mrb[0].mxu0 %vm939_vm0, %v950_v19 }
 0x25c   : > { %v1037_v21 = vpop.f32.mrb[0].mxu0 }
 0x25d   : > { %v1038_v22 = vadd.f32 %v1037_v21, %v951_v20  ;;  %v4044_v23 = vpop.f32.mrb[1].mxu0 }
 0x25f   : > { %1042 = vst.msk [vmem:[#allocation3] sm:$0xff] %vm1041_vm3, %v1038_v22 }
 0x260 PF: > { %v1052_v24 = vld [vmem:[%s4826_s22 + $0x20] sm:$0xff]  ;;  %v1053_v25 = vld [vmem:[%s4826_s22 + $0x28] sm:$0xff]  ;;  %vm1065_vm4 = vcmask 261120   ;;  %v4608_v27 = vmov 0.0|0.0   ;;  %vm4609_vm6 = vmmov 0   ;;  %v4610_v32 = vmov 0.0   ;;  %s5480_s4 = scalar_lea.vmem %s5389_s7, %s4820_s23  ;;  %s5481_s28 = scalar_lea.vmem %s5391_s9, %s4808_s1 }
 0x261   : > { %v1048_v26 = vld [vmem:[%s4826_s22] sm:$0xff]  ;;  %4264 = vmatprep.subr.bf16.mxu1 %v4608_v27  ;;  %vm4925_vm5 = vmpackc.low %vm1065_vm4, %vm1065_vm4  ;;  %v4265_v29 = vpack.c.bf16 %v1053_v25, %v1052_v24  ;;  %4256 = vmatprep.subr.bf16.mxu0 %v4608_v27  ;;  %v1049_v30 = vld [vmem:[%s4826_s22 + $0x8] sm:$0xff]  ;;  %v1061_v40 = vlaneseq  ;;  %vm1334_vm7 = vcmask 64512   ;;  %s4611_s20 = smov 120   ;;  %s4612_s6 = smov 112   ;;  %vm2004_vm8 = vcmask 130048  }
 0x262   : > { %v4257_v31 = vpack.c.bf16 %v1049_v30, %v1048_v26  ;;  %4064 = vmatprep.mubr.msk.f32.mxu1 %vm4609_vm6, %v4610_v32  ;;  %4053 = vmatprep.mubr.msk.f32.mxu0 %vm4609_vm6, %v4610_v32  ;;  %v1054_v33 = vld [vmem:[%s4826_s22 + $0x30] sm:$0xff]  ;;  %v1055_v34 = vld [vmem:[%s4826_s22 + $0x38] sm:$0xff]  ;;  %v1060_v43 = vld [vmem:[%s5480_s4] sm:$0x7]  ;;  %s4613_s12 = smov 104   ;;  %s4615_s13 = smov 16  }
 0x263   : > { %4267 = vmatpush3.bf16.xpose.msk.msra.mxu1 %vm4925_vm5, %v4265_v29  ;;  %v1050_v35 = vld [vmem:[%s4826_s22 + $0x10] sm:$0xff]  ;;  %v1051_v36 = vld [vmem:[%s4826_s22 + $0x18] sm:$0xff]  ;;  %v4269_v37 = vpack.c.bf16 %v1055_v34, %v1054_v33  ;;  %v1062_v41 = vshrl.u32 %v1061_v40, 7  ;;  %v1056_v53 = vld [vmem:[%s4826_s22 + $0x40] sm:$0xff]  ;;  %s4616_s30 = smov 24   ;;  %vm2006_vm9 = vcmask 195584  }
 0x264   : > { %4259 = vmatpush3.bf16.xpose.msk.msra.mxu0 %vm4925_vm5, %v4257_v31  ;;  %4268 = vmatprep.subr.bf16.mxu1 %v4608_v27  ;;  %v4261_v38 = vpack.c.bf16 %v1051_v36, %v1050_v35  ;;  %v1057_v54 = vld [vmem:[%s4826_s22 + $0x48] sm:$0xff]  ;;  %v1058_v56 = vld [vmem:[%s4826_s22 + $0x50] sm:$0xff]  ;;  %v1059_v57 = vld [vmem:[%s4826_s22 + $0x58] sm:$0xff]  ;;  %s4614_s22 = smov 8   ;;  %s5484_s19 = sld [smem:[#allocation34_spill]]  ;;  %vm3316_vm10 = vcmask 523264  }
 0x265   : > { %4260 = vmatprep.subr.bf16.mxu0 %v4608_v27  ;;  %v4961_v42 = vsub.s32 1, %v1062_v41  ;;  %v4968_v44 = vsub.s32 0, %v1062_v41  ;;  %v4273_v55 = vpack.c.bf16 %v1057_v54, %v1056_v53  ;;  %v4277_v58 = vpack.c.bf16 %v1059_v57, %v1058_v56  ;;  %vm4338_vm11 = vmpackc.low %vm3316_vm10, %vm3316_vm10 }
 0x266   : > { %v4999_v5 = vsub.s32 2, %v1062_v41 }
 0x267   : > { %v4951_v39 = vld [vmem:[#allocation2] sm:$0xff]  ;;  %v1154_v45 = vrot.slane %v1060_v43, %v4961_v42  ;;  %v1064_v46 = vrot.slane %v1060_v43, %v4968_v44 }
 0x268   : > { %v1240_v6 = vrot.slane %v1060_v43, %v4999_v5 }
 0x26a   : > { %s5485_s4 = scalar_lea.vmem %s5484_s19, %s4820_s23 }
 0x26b   : > { %4271 = vmatpush3.bf16.xpose.msk.msra.mxu1 %vm4925_vm5, %v4269_v37 }
 0x26c   : > { %4263 = vmatpush3.bf16.xpose.msk.msra.mxu0 %vm4925_vm5, %v4261_v38  ;;  %4078 = vmatprep.subr.mxu1 %v4610_v32 }
 0x26d   : > { %4272 = vmatprep.subr.bf16.mxu0 %v4608_v27 }
 0x272   : > { %4065 = vmatmul.mubr.msk.f32.vlgmr.msra.gmra.mrb[0].mxu1 %vm1065_vm4, %v4951_v39 }
 0x273   : > { %4054 = vmatmul.mubr.msk.f32.vlgmr.msra.gmra.mrb[0].mxu0 %vm1065_vm4, %v4951_v39  ;;  %4080 = vmatprep.mubr.msk.f32.mxu1 %vm4609_vm6, %v4610_v32 }
 0x274   : > { %4075 = vmatprep.mubr.msk.f32.mxu0 %vm4609_vm6, %v4610_v32  ;;  %4275 = vmatpush3.bf16.xpose.msk.msra.mxu0 %vm4925_vm5, %v4273_v55 }
 0x275   : > { %4276 = vmatprep.subr.bf16.mxu0 %v4608_v27 }
 0x27c   : > { %4279 = vmatpush3.bf16.xpose.msk.msra.mxu0 %vm4925_vm5, %v4277_v58 }
 0x27d   : > { %4098 = vmatprep.subr.mxu0 %v4610_v32 }
 0x283   : > { %4076 = vmatmul.mubr.msk.f32.vlgmr.msra.gmra.mrb[2].mxu0 %vm1065_vm4, %v4951_v39 }
 0x284   : > { %4100 = vmatprep.mubr.msk.f32.mxu0 %vm4609_vm6, %v4610_v32 }
 0x345   : > { %v1233_v47 = vpop.f32.mrb[0].mxu1 }
 0x346   : > { %v1234_v48 = vadd.f32 %v1233_v47, %v1154_v45  ;;  %v4066_v49 = vpop.f32.mrb[1].mxu1  ;;  %v1147_v50 = vpop.f32.mrb[0].mxu0 }
 0x347   : > { %v1148_v51 = vadd.f32 %v1147_v50, %v1064_v46  ;;  %v4055_v52 = vpop.f32.mrb[1].mxu0 }
 0x348   : > { %1497 = vrot.lane.b32.xlu1 %v1234_v48, %s4611_s20  ;;  %4079 = vmatpush3.xpose.msk.msra.mxu1 %vm1334_vm7, %v1234_v48 }
 0x349   : > { %4083 = vmatprep.subr.mxu1 %v4610_v32 }
 0x34b   : > { %4081 = vmatmul.mubr.msk.f32.vlgmr.msra.gmra.mrb[2].mxu1 %vm1334_vm7, %v1148_v51 }
 0x34c   : > { %1495 = vrot.lane.b32.xlu1 %v1148_v51, %s4611_s20  ;;  %4085 = vmatprep.mubr.msk.f32.mxu1 %vm4609_vm6, %v4610_v32 }
 0x350   : > { %1661 = vrot.lane.b32.xlu1 %v1148_v51, %s4612_s6 }
 0x354   : > { %1828 = vrot.lane.b32.xlu1 %v1234_v48, %s4613_s12 }
 0x356   : > { %v1319_v7 = vpop.f32.mrb[2].mxu0 }
 0x357   : > { %v5002_v8 = vadd.f32 %v1319_v7, %v1240_v6  ;;  %v4077_v9 = vpop.f32.mrb[3].mxu0  ;;  %v1325_v7 = vld [vmem:[%s4835_s5 + $0x10] sm:$0xff] }
 0x358   : > { %1826 = vrot.lane.b32.xlu1 %v1148_v51, %s4613_s12 }
 0x359   : > { %4084 = vmatpush3.msra.mxu1 %v5002_v8 }
 0x35a   : > { %4088 = vmatprep.subr.mxu1 %v4610_v32 }
 0x3ba   : > { %v1498_v10 = vpop.permute.xlu1 %1497 }
 0x3be   : > { %v1496_v11 = vpop.permute.xlu1 %1495 }
 0x3c2   : > { %v1662_v12 = vpop.permute.xlu1 %1661 }
 0x3c6   : > { %v1829_v15 = vpop.permute.xlu1 %1828 }
 0x3ca   : > { %v1827_v17 = vpop.permute.xlu1 %1826 }
 0x41e   : > { %v1407_v59 = vpop.f32.mrb[2].mxu1 }
 0x41f   : > { %v1408_v60 = vadd.f32 %v4817_v0, %v1407_v59  ;;  %v4082_v61 = vpop.f32.mrb[3].mxu1 }
 0x421   : > { %v1411_v62 = vsel %vm1334_vm7, %v1408_v60, -inf }
 0x422   : > { %1412 = vmax.xlane.f32.xlu0 %v1411_v62 }
 0x4af   : > { %v1413_v63 = vpop.xlane.xlu0 %1412 }
 0x4b0   : > { %v1414_v1 = vsub.f32 %v1408_v60, %v1413_v63 }
 0x4b2   : > { %v1415_v2 = vmul.f32 1.442695, %v1414_v1 }
 0x4b4   : > { %4439 = vpow2.f32 %v1415_v2 }
 0x4be   : > { %v4440_v3 = vpop.eup %4439 }
 0x4bf   : > { %v1417_v4 = vsel %vm1334_vm7, %v4440_v3, 0.0 }
 0x4c0   : > { %1418 = vadd.xlane.f32.xlu0 %v1417_v4  ;;  %v1324_v4 = vld [vmem:[%s4835_s5 + $0x8] sm:$0xff] }
 0x4d6   : > { %1663 = vrot.lane.b32.xlu0 %v1234_v48, %s4612_s6 }
 0x54d   : > { %v1419_v13 = vpop.xlane.xlu0 %1418 }
 0x54e   : > { %4441 = vrcp.f32 %v1419_v13 }
 0x551   : > { %v1664_v14 = vpop.permute.xlu0 %1663 }
 0x552   : > { %4099 = vmatpush3.xpose.msk.msra.mxu0 %vm1334_vm7, %v1664_v14 }
 0x553   : > { %4108 = vmatprep.subr.mxu0 %v4610_v32 }
 0x555   : > { %4101 = vmatmul.mubr.msk.f32.vlgmr.msra.gmra.mrb[4].mxu0 %vm1334_vm7, %v1662_v12 }
 0x556   : > { %4109 = vmatpush3.xpose.msk.msra.mxu0 %vm1334_vm7, %v1829_v15  ;;  %4110 = vmatprep.mubr.msk.f32.mxu0 %vm4609_vm6, %v4610_v32 }
 0x557   : > { %4280 = vmatprep.subr.bf16.mxu0 %v4608_v27 }
 0x558   : > { %v4442_v16 = vpop.eup %4441 }
 0x559   : > { %v1421_v18 = vmul.f32 %v4442_v16, %v4440_v3  ;;  %4111 = vmatmul.mubr.msk.f32.vlgmr.msra.gmra.mrb[6].mxu0 %vm1334_vm7, %v1827_v17  ;;  %v1323_v3 = vld [vmem:[%s4835_s5] sm:$0xff] }
 0x55a   : > { %4126 = vmatprep.mubr.msk.f32.mxu0 %vm4609_vm6, %v4610_v32  ;;  %v4281_v6 = vpack.c.bf16 %v1324_v4, %v1323_v3 }
 0x55b   : > { %4086 = vmatmul.mubr.msk.f32.vlgmr.msra.gmra.mrb[4].mxu1 %vm1334_vm7, %v1421_v18 }
 0x55c   : > { %4089 = vmatpush3.xpose.msk.msra.mxu1 %vm1334_vm7, %v1498_v10  ;;  %4090 = vmatprep.mubr.msk.f32.mxu1 %vm4609_vm6, %v4610_v32 }
 0x55d   : > { %4093 = vmatprep.subr.mxu1 %v4610_v32  ;;  %4283 = vmatpush3.bf16.xpose.msk.msra.mxu0 %vm4925_vm5, %v4281_v6 }
 0x55e   : > { %4284 = vmatprep.subr.bf16.mxu0 %v4608_v27 }
 0x55f   : > { %4091 = vmatmul.mubr.msk.f32.vlgmr.msra.gmra.mrb[6].mxu1 %vm1334_vm7, %v1496_v11 }
 0x560   : > { %4095 = vmatprep.mubr.msk.f32.mxu1 %vm4609_vm6, %v4610_v32 }
 0x628   : > { %v1735_v19 = vpop.f32.mrb[4].mxu0 }
 0x629   : > { %v1736_v20 = vadd.f32 %v4817_v0, %v1735_v19  ;;  %v4102_v21 = vpop.f32.mrb[5].mxu0 }
 0x62b   : > { %v1739_v22 = vsel %vm1334_vm7, %v1736_v20, -inf }
 0x62c   : > { %1740 = vmax.xlane.f32.xlu0 %v1739_v22  ;;  %v1900_v23 = vpop.f32.mrb[6].mxu0  ;;  %v3872_v22 = vld [vmem:[%s5481_s28] ss:$0 sm:$0xff] }
 0x62d   : > { %v4112_v24 = vpop.f32.mrb[7].mxu0  ;;  %v1901_v33 = vadd.f32 %v4817_v0, %v1900_v23 }
 0x62e   : > { %v5027_v25 = vpop.f32.mrb[4].mxu1 }
 0x62f   : > { %v4087_v26 = vpop.f32.mrb[5].mxu1  ;;  %v1904_v35 = vsel %vm1334_vm7, %v1901_v33, -inf }
 0x632   : > { %v1569_v29 = vpop.f32.mrb[6].mxu1 }
 0x633   : > { %v1570_v30 = vadd.f32 %v4817_v0, %v1569_v29  ;;  %v4092_v31 = vpop.f32.mrb[7].mxu1 }
 0x635   : > { %v1573_v34 = vsel %vm1334_vm7, %v1570_v30, -inf }
 0x636   : > { %1574 = vmax.xlane.f32.xlu1 %v1573_v34 }
 0x63a   : > { %1905 = vmax.xlane.f32.xlu1 %v1904_v35 }
 0x6b9   : > { %v1741_v36 = vpop.xlane.xlu0 %1740 }
 0x6ba   : > { %v1742_v37 = vsub.f32 %v1736_v20, %v1741_v36  ;;  %v2128_v36 = vld [vmem:[%s4844_s16 + $0x20] sm:$0xff] }
 0x6bc   : > { %v1743_v38 = vmul.f32 1.442695, %v1742_v37  ;;  %v2129_v37 = vld [vmem:[%s4844_s16 + $0x28] sm:$0xff] }
 0x6be   : > { %4443 = vpow2.f32 %v1743_v38  ;;  %v4297_v38 = vpack.c.bf16 %v2129_v37, %v2128_v36 }
 0x6c3   : > { %v1575_v40 = vpop.xlane.xlu1 %1574 }
 0x6c4   : > { %v1576_v50 = vsub.f32 %v1570_v30, %v1575_v40  ;;  %v2125_v40 = vld [vmem:[%s4844_s16 + $0x8] sm:$0xff] }
 0x6c6   : > { %v1577_v51 = vmul.f32 1.442695, %v1576_v50  ;;  %v1045_v50 = vld [vmem:[#allocation3] sm:$0xff] }
 0x6c7   : > { %v1906_v41 = vpop.xlane.xlu1 %1905 }
 0x6c8   : > { %v4444_v43 = vpop.eup %4443  ;;  %v1907_v45 = vsub.f32 %v1901_v33, %v1906_v41 }
 0x6c9   : > { %v1745_v46 = vsel %vm1334_vm7, %v4444_v43, 0.0 }
 0x6ca   : > { %v1908_v47 = vmul.f32 1.442695, %v1907_v45  ;;  %1746 = vadd.xlane.f32.xlu0 %v1745_v46  ;;  %v2131_v45 = vld [vmem:[%s4844_s16 + $0x38] sm:$0xff] }
 0x6cc   : > { %4445 = vpow2.f32 %v1908_v47  ;;  %v2126_v47 = vld [vmem:[%s4844_s16 + $0x10] sm:$0xff] }
 0x6cd   : > { %4447 = vpow2.f32 %v1577_v51 }
 0x6d6   : > { %v4446_v48 = vpop.eup %4445 }
 0x6d7   : > { %v1910_v49 = vsel %vm1334_vm7, %v4446_v48, 0.0  ;;  %v4448_v52 = vpop.eup %4447 }
 0x6d8   : > { %1911 = vadd.xlane.f32.xlu1 %v1910_v49  ;;  %v1579_v53 = vsel %vm1334_vm7, %v4448_v52, 0.0 }
 0x6e0   : > { %1585 = vrot.lane.b32.xlu0 %v5002_v8, %s4611_s20 }
 0x6e9   : > { %1750 = vrot.lane.b32.xlu1 %v5002_v8, %s4612_s6 }
 0x70d   : > { %1580 = vadd.xlane.f32.xlu1 %v1579_v53 }
 0x71e   : > { %1915 = vrot.lane.b32.xlu1 %v5002_v8, %s4613_s12  ;;  %v1326_v8 = vld [vmem:[%s4835_s5 + $0x18] sm:$0xff] }
 0x71f   : > { %v4285_v9 = vpack.c.bf16 %v1326_v8, %v1325_v7 }
 0x721   : > { %4287 = vmatpush3.bf16.xpose.msk.msra.mxu0 %vm4925_vm5, %v4285_v9 }
 0x722   : > { %4296 = vmatprep.subr.bf16.mxu0 %v4608_v27 }
 0x757   : > { %v1747_v54 = vpop.xlane.xlu0 %1746 }
 0x75b   : > { %v1586_v55 = vpop.permute.xlu0 %1585 }
 0x75c   : > { %4094 = vmatpush3.msra.mxu1 %v1586_v55  ;;  %v5117_v55 = vld [vmem:[%s932_s15] sm:$0x7] }
 0x75d   : > { %4103 = vmatprep.subr.mxu1 %v4610_v32 }
 0x765   : > { %v1912_v56 = vpop.xlane.xlu1 %1911 }
 0x769   : > { %v1751_v57 = vpop.permute.xlu1 %1750 }
 0x79a   : > { %v1581_v58 = vpop.xlane.xlu1 %1580 }
 0x79b   : > { %4449 = vrcp.f32 %v1581_v58 }
 0x79c   : > { %4451 = vrcp.f32 %v1747_v54  ;;  %v5110_v54 = vld [vmem:[%s928_s11] sm:$0x7] }
 0x79d   : > { %4453 = vrcp.f32 %v1912_v56  ;;  %v2117_v56 = vrot.slane %v5110_v54, %v4968_v44 }
 0x79e   : > { %v1916_v1 = vpop.permute.xlu1 %1915 }
 0x7a5   : > { %v4450_v59 = vpop.eup %4449 }
 0x7a6   : > { %v1583_v60 = vmul.f32 %v4450_v59, %v4448_v52  ;;  %v4452_v61 = vpop.eup %4451  ;;  %v2122_v59 = vrot.slane %v5117_v55, %v4968_v44 }
 0x7a7   : > { %v1749_v62 = vmul.f32 %v4452_v61, %v4444_v43  ;;  %v4454_v63 = vpop.eup %4453  ;;  %v2130_v43 = vld [vmem:[%s4844_s16 + $0x30] sm:$0xff] }
 0x7a8   : > { %4096 = vmatmul.mubr.msk.f32.vlgmr.msra.gmra.mrb[8].mxu1 %vm1334_vm7, %v1583_v60  ;;  %v1914_v2 = vmul.f32 %v4454_v63, %v4446_v48  ;;  %v4301_v46 = vpack.c.bf16 %v2131_v45, %v2130_v43  ;;  %v2127_v48 = vld [vmem:[%s4844_s16 + $0x18] sm:$0xff] }
 0x7a9   : > { %4104 = vmatpush3.msra.mxu1 %v1751_v57  ;;  %4105 = vmatprep.mubr.msk.f32.mxu1 %vm4609_vm6, %v4610_v32  ;;  %v4293_v49 = vpack.c.bf16 %v2127_v48, %v2126_v47 }
 0x7aa   : > { %4113 = vmatprep.subr.mxu1 %v4610_v32 }
 0x7ac   : > { %4106 = vmatmul.mubr.msk.f32.vlgmr.msra.gmra.mrb[10].mxu1 %vm1334_vm7, %v1749_v62  ;;  %v5134_v62 = vld [vmem:[%s5485_s4] sm:$0x7] }
 0x7ad   : > { %4114 = vmatpush3.msra.mxu1 %v1916_v1  ;;  %4115 = vmatprep.mubr.msk.f32.mxu1 %vm4609_vm6, %v4610_v32  ;;  %v2229_v63 = vrot.slane %v5134_v62, %v4961_v42  ;;  %v2140_v4 = vrot.slane %v5134_v62, %v4968_v44  ;;  %v2132_v44 = vld [vmem:[%s4844_s16 + $0x40] sm:$0xff]  ;;  %v2318_v43 = vrot.slane %v5134_v62, %v4999_v5 }
 0x7ae   : > { %4288 = vmatprep.subr.bf16.mxu1 %v4608_v27 }
 0x7b0   : > { %4116 = vmatmul.mubr.msk.f32.vlgmr.msra.gmra.mrb[12].mxu1 %vm1334_vm7, %v1914_v2 }
 0x7b1   : > { %4137 = vmatprep.mubr.msk.f32.mxu1 %vm4609_vm6, %v4610_v32 }
 0x87b   : > { %v1657_v10 = vpop.f32.mrb[8].mxu1 }
 0x87c   : > { %1992 = vrot.lane.b32.xlu0 %v1657_v10, %s4614_s22  ;;  %v4097_v11 = vpop.f32.mrb[9].mxu1  ;;  %v2133_v10 = vld [vmem:[%s4844_s16 + $0x48] sm:$0xff] }
 0x87d   : > { %v4305_v11 = vpack.c.bf16 %v2133_v10, %v2132_v44 }
 0x87f   : > { %v1822_v12 = vpop.f32.mrb[10].mxu1 }
 0x880   : > { %1996 = vrot.lane.b32.xlu1 %v1822_v12, %s4615_s13  ;;  %v4107_v13 = vpop.f32.mrb[11].mxu1  ;;  %v2134_v12 = vld [vmem:[%s4844_s16 + $0x50] sm:$0xff] }
 0x881   : > { %v2135_v13 = vld [vmem:[%s4844_s16 + $0x58] sm:$0xff] }
 0x883   : > { %v1987_v14 = vpop.f32.mrb[12].mxu1 }
 0x884   : > { %2000 = vrot.lane.b32.xlu0 %v1987_v14, %s4616_s30  ;;  %v4117_v15 = vpop.f32.mrb[13].mxu1  ;;  %v4309_v14 = vpack.c.bf16 %v2135_v13, %v2134_v12 }
 0x8ee   : > { %v1993_v16 = vpop.permute.xlu0 %1992 }
 0x8ef   : > { %v2003_v18 = vsel %vm1334_vm7, %v5027_v25, %v1993_v16 }
 0x8f2   : > { %v1997_v17 = vpop.permute.xlu1 %1996 }
 0x8f3   : > { %v2005_v19 = vsel %vm2004_vm8, %v2003_v18, %v1997_v17 }
 0x8f6   : > { %v2001_v20 = vpop.permute.xlu0 %2000 }
 0x8f7   : > { %v2007_v21 = vsel %vm2006_vm9, %v2005_v19, %v2001_v20 }
 0x8f8   : > { %4127 = vmatmul.mubr.msk.f32.vlgmr.msra.gmra.mrb[8].mxu0 %vm1065_vm4, %v2007_v21 }
 0x8f9   : > { %4148 = vmatprep.mubr.msk.f32.mxu0 %vm4609_vm6, %v4610_v32  ;;  %4299 = vmatpush3.bf16.xpose.msk.msra.mxu0 %vm4925_vm5, %v4297_v38 }
 0x8fa   : > { %4300 = vmatprep.subr.bf16.mxu0 %v4608_v27 }
 0x901   : > { %4303 = vmatpush3.bf16.xpose.msk.msra.mxu0 %vm4925_vm5, %v4301_v46 }
 0x902   : > { %4162 = vmatprep.subr.mxu0 %v4610_v32 }
 0x908   : > { %4149 = vmatmul.mubr.msk.f32.vlgmr.msra.gmra.mrb[10].mxu0 %vm1065_vm4, %v1045_v50 }
 0x909   : > { %4164 = vmatprep.mubr.msk.f32.mxu0 %vm4609_vm6, %v4610_v32 }
 0x9cb   : > { %v2095_v23 = vpop.f32.mrb[8].mxu0 }
 0x9cc   : > { %v2096_v24 = vadd.f32 %v3872_v22, %v2095_v23  ;;  %v4128_v25 = vpop.f32.mrb[9].mxu0 }
 0x9ce   : > { %v2099_v26 = vadd.f32 %v2096_v24, %v4951_v39  ;;  %v2124_v39 = vld [vmem:[%s4844_s16] sm:$0xff]  ;;  %s5486_s16 = sld [smem:[#allocation24_spill]] }
 0x9cf   : > { %v4289_v41 = vpack.c.bf16 %v2125_v40, %v2124_v39 }
 0x9d0   : > { %v2100_v29 = vsel %vm1065_vm4, %v2099_v26, 0.0 }
 0x9d1   : > { %2101 = vadd.xlane.f32.xlu1 %v2100_v29  ;;  %4291 = vmatpush3.bf16.xpose.msk.msra.mxu1 %vm4925_vm5, %v4289_v41 }
 0x9d2   : > { %4292 = vmatprep.subr.bf16.mxu1 %v4608_v27 }
 0x9d9   : > { %4295 = vmatpush3.bf16.xpose.msk.msra.mxu1 %vm4925_vm5, %v4293_v49 }
 0x9da   : > { %4304 = vmatprep.subr.bf16.mxu1 %v4608_v27 }
 0x9db   : > { %v2311_v1 = vpop.f32.mrb[10].mxu0 }
 0x9dc   : > { %v2312_v2 = vadd.f32 %v2311_v1, %v2229_v63  ;;  %v4150_v3 = vpop.f32.mrb[11].mxu0 }
 0x9de   : > { %4163 = vmatpush3.xpose.msk.msra.mxu0 %vm1334_vm7, %v2312_v2 }
 0x9df   : > { %4172 = vmatprep.subr.mxu0 %v4610_v32 }
 0xa5e   : > { %v2102_v30 = vpop.xlane.xlu1 %2101 }
 0xa5f   : > { %v2104_v31 = vmul.f32 0.03125, %v2102_v30 }
 0xa61   : > { %v2105_v33 = vsub.f32 %v2099_v26, %v2104_v31 }
 0xa63   : > { %v2106_v34 = vmul.f32 %v2105_v33, %v2105_v33 }
 0xa65   : > { %v2107_v35 = vsel %vm1065_vm4, %v2106_v34, 0.0 }
 0xa66   : > { %2108 = vadd.xlane.f32.xlu0 %v2107_v35 }
 0xa7c   : > { %2568 = vrot.lane.b32.xlu0 %v2312_v2, %s4611_s20 }
 0xaf3   : > { %v2109_v51 = vpop.xlane.xlu0 %2108 }
 0xaf4   : > { %v2110_v52 = vmul.f32 0.03125, %v2109_v51 }
 0xaf6   : > { %v2111_v53 = vadd.f32 1e-05, %v2110_v52 }
 0xaf7   : > { %v2569_v9 = vpop.permute.xlu0 %2568 }
 0xaf8   : > { %4455 = vrsqrt.f32 %v2111_v53 }
 0xb02   : > { %v4456_v57 = vpop.eup %4455 }
 0xb03   : > { %v2113_v58 = vmul.f32 %v4456_v57, %v2105_v33 }
 0xb05   : > { %v2118_v60 = vmul.f32 %v2117_v56, %v2113_v58 }
 0xb07   : > { %v5123_v61 = vadd.f32 %v2122_v59, %v2118_v60 }
 0xb09   : > { %4138 = vmatmul.mubr.msk.f32.vlgmr.msra.gmra.mrb[14].mxu1 %vm1065_vm4, %v5123_v61 }
 0xb0a   : > { %4159 = vmatprep.mubr.msk.f32.mxu1 %vm4609_vm6, %v4610_v32  ;;  %4307 = vmatpush3.bf16.xpose.msk.msra.mxu1 %vm4925_vm5, %v4305_v11 }
 0xb0b   : > { %4308 = vmatprep.subr.bf16.mxu1 %v4608_v27 }
 0xb12   : > { %4311 = vmatpush3.bf16.xpose.msk.msra.mxu1 %vm4925_vm5, %v4309_v14 }
 0xb13   : > { %4167 = vmatprep.subr.mxu1 %v4610_v32 }
 0xb19   : > { %4160 = vmatmul.mubr.msk.f32.vlgmr.msra.gmra.mrb[16].mxu1 %vm1065_vm4, %v1045_v50 }
 0xb1a   : > { %4169 = vmatprep.mubr.msk.f32.mxu1 %vm4609_vm6, %v4610_v32 }
 0xbdc   : > { %v2222_v6 = vpop.f32.mrb[14].mxu1 }
 0xbdd   : > { %v2223_v7 = vadd.f32 %v2222_v6, %v2140_v4  ;;  %v4139_v8 = vpop.f32.mrb[15].mxu1 }
 0xbdf   : > { %2566 = vrot.lane.b32.xlu1 %v2223_v7, %s4611_s20  ;;  %2732 = vrot.lane.b32.xlu0 %v2223_v7, %s4612_s6 }
 0xbe0   : > { %4165 = vmatmul.mubr.msk.f32.vlgmr.msra.gmra.mrb[12].mxu0 %vm1334_vm7, %v2223_v7 }
 0xbe1   : > { %4173 = vmatpush3.xpose.msk.msra.mxu0 %vm1334_vm7, %v2569_v9  ;;  %4174 = vmatprep.mubr.msk.f32.mxu0 %vm4609_vm6, %v4610_v32 }
 0xbe2   : > { %4182 = vmatprep.subr.mxu0 %v4610_v32 }
 0xbe3   : > { %2734 = vrot.lane.b32.xlu1 %v2312_v2, %s4612_s6  ;;  %2897 = vrot.lane.b32.xlu0 %v2223_v7, %s4613_s12 }
 0xbe7   : > { %2899 = vrot.lane.b32.xlu1 %v2312_v2, %s4613_s12 }
 0xbec   : > { %v2397_v45 = vpop.f32.mrb[16].mxu1 }
 0xbed   : > { %v4161_v46 = vpop.f32.mrb[17].mxu1  ;;  %v2398_v47 = vadd.f32 %v2397_v45, %v2318_v43 }
 0xbef   : > { %4168 = vmatpush3.msra.mxu1 %v2398_v47 }
 0xbf0   : > { %4177 = vmatprep.subr.mxu1 %v4610_v32 }
 0xc51   : > { %v2567_v15 = vpop.permute.xlu1 %2566  ;;  %v2733_v17 = vpop.permute.xlu0 %2732 }
 0xc52   : > { %4175 = vmatmul.mubr.msk.f32.vlgmr.msra.gmra.mrb[14].mxu0 %vm1334_vm7, %v2567_v15 }
 0xc53   : > { %4184 = vmatprep.mubr.msk.f32.mxu0 %vm4609_vm6, %v4610_v32 }
 0xc55   : > { %v2735_v16 = vpop.permute.xlu1 %2734  ;;  %v2898_v19 = vpop.permute.xlu0 %2897 }
 0xc56   : > { %4183 = vmatpush3.xpose.msk.msra.mxu0 %vm1334_vm7, %v2735_v16 }
 0xc57   : > { %4192 = vmatprep.subr.mxu0 %v4610_v32 }
 0xc59   : > { %v2900_v18 = vpop.permute.xlu1 %2899  ;;  %4185 = vmatmul.mubr.msk.f32.vlgmr.msra.gmra.mrb[16].mxu0 %vm1334_vm7, %v2733_v17 }
 0xc5a   : > { %4193 = vmatpush3.xpose.msk.msra.mxu0 %vm1334_vm7, %v2900_v18  ;;  %4194 = vmatprep.mubr.msk.f32.mxu0 %vm4609_vm6, %v4610_v32 }
 0xc5b   : > { %4312 = vmatprep.subr.bf16.mxu0 %v4608_v27 }
 0xc5d   : > { %4195 = vmatmul.mubr.msk.f32.vlgmr.msra.gmra.mrb[18].mxu0 %vm1334_vm7, %v2898_v19 }
 0xc5e   : > { %4210 = vmatprep.mubr.msk.f32.mxu0 %vm4609_vm6, %v4610_v32 }
 0xcb3   : > { %v2478_v20 = vpop.f32.mrb[12].mxu0 }
 0xcb4   : > { %v2479_v21 = vadd.f32 %v4817_v0, %v2478_v20  ;;  %v4166_v22 = vpop.f32.mrb[13].mxu0 }
 0xcb5   : > { %v2402_v22 = vld [vmem:[%s5486_s16 + $0x8] sm:$0xff] }
 0xcb6   : > { %v2482_v23 = vsel %vm1334_vm7, %v2479_v21, -inf }
 0xcb7   : > { %2483 = vmax.xlane.f32.xlu1 %v2482_v23 }
 0xd25   : > { %v2640_v24 = vpop.f32.mrb[14].mxu0 }
 0xd26   : > { %v2641_v25 = vadd.f32 %v4817_v0, %v2640_v24  ;;  %v4176_v26 = vpop.f32.mrb[15].mxu0  ;;  %v2403_v24 = vld [vmem:[%s5486_s16 + $0x10] sm:$0xff] }
 0xd28   : > { %v2644_v29 = vsel %vm1334_vm7, %v2641_v25, -inf }
 0xd29   : > { %2645 = vmax.xlane.f32.xlu0 %v2644_v29 }
 0xd2c   : > { %v2806_v30 = vpop.f32.mrb[16].mxu0 }
 0xd2d   : > { %v2807_v31 = vadd.f32 %v4817_v0, %v2806_v30  ;;  %v4186_v33 = vpop.f32.mrb[17].mxu0 }
 0xd2f   : > { %v2810_v34 = vsel %vm1334_vm7, %v2807_v31, -inf }
 0xd30   : > { %2811 = vmax.xlane.f32.xlu0 %v2810_v34  ;;  %v2971_v35 = vpop.f32.mrb[18].mxu0 }
 0xd31   : > { %v2972_v36 = vadd.f32 %v4817_v0, %v2971_v35  ;;  %v4196_v37 = vpop.f32.mrb[19].mxu0 }
 0xd33   : > { %v2975_v38 = vsel %vm1334_vm7, %v2972_v36, -inf }
 0xd34   : > { %2976 = vmax.xlane.f32.xlu1 %v2975_v38 }
 0xd44   : > { %v2484_v39 = vpop.xlane.xlu1 %2483 }
 0xd45   : > { %v2485_v40 = vsub.f32 %v2479_v21, %v2484_v39  ;;  %v2401_v21 = vld [vmem:[%s5486_s16] sm:$0xff] }
 0xd46   : > { %v4313_v23 = vpack.c.bf16 %v2402_v22, %v2401_v21 }
 0xd47   : > { %v2486_v41 = vmul.f32 1.442695, %v2485_v40 }
 0xd48   : > { %4315 = vmatpush3.bf16.xpose.msk.msra.mxu0 %vm4925_vm5, %v4313_v23 }
 0xd49   : > { %4457 = vpow2.f32 %v2486_v41  ;;  %4316 = vmatprep.subr.bf16.mxu0 %v4608_v27 }
 0xd53   : > { %v4458_v48 = vpop.eup %4457 }
 0xd54   : > { %v2488_v0 = vsel %vm1334_vm7, %v4458_v48, 0.0 }
 0xd55   : > { %2489 = vadd.xlane.f32.xlu0 %v2488_v0 }
 0xdb6   : > { %v2646_v49 = vpop.xlane.xlu0 %2645 }
 0xdb7   : > { %v2647_v50 = vsub.f32 %v2641_v25, %v2646_v49  ;;  %v2404_v25 = vld [vmem:[%s5486_s16 + $0x18] sm:$0xff]  ;;  %v3192_v49 = vld [vmem:[%s4867_s10] sm:$0xff] }
 0xdb8   : > { %v4317_v30 = vpack.c.bf16 %v2404_v25, %v2403_v24 }
 0xdb9   : > { %v2648_v51 = vmul.f32 1.442695, %v2647_v50  ;;  %v3193_v50 = vld [vmem:[%s4867_s10 + $0x8] sm:$0xff] }
 0xdba   : > { %4319 = vmatpush3.bf16.xpose.msk.msra.mxu0 %vm4925_vm5, %v4317_v30 }
 0xdbb   : > { %4459 = vpow2.f32 %v2648_v51  ;;  %4336 = vmatprep.subr.bf16.mxu0 %v4608_v27  ;;  %v4321_v51 = vpack.c.bf16 %v3193_v50, %v3192_v49 }
 0xdbd   : > { %v2812_v52 = vpop.xlane.xlu0 %2811 }
 0xdbe   : > { %v2813_v53 = vsub.f32 %v2807_v31, %v2812_v52  ;;  %v3195_v52 = vld [vmem:[%s4867_s10 + $0x18] sm:$0xff] }
 0xdc0   : > { %v2814_v56 = vmul.f32 1.442695, %v2813_v53 }
 0xdc1   : > { %v2977_v63 = vpop.xlane.xlu1 %2976 }
 0xdc2   : > { %4461 = vpow2.f32 %v2814_v56  ;;  %v2978_v1 = vsub.f32 %v2972_v36, %v2977_v63 }
 0xdc4   : > { %v2979_v2 = vmul.f32 1.442695, %v2978_v1  ;;  %v3198_v1 = vld [vmem:[%s4867_s10 + $0x30] sm:$0xff] }
 0xdc5   : > { %v4460_v57 = vpop.eup %4459 }
 0xdc6   : > { %v2650_v58 = vsel %vm1334_vm7, %v4460_v57, 0.0 }
 0xdc7   : > { %2651 = vadd.xlane.f32.xlu1 %v2650_v58 }
 0xdcc   : > { %v4462_v59 = vpop.eup %4461 }
 0xdcd   : > { %v2816_v60 = vsel %vm1334_vm7, %v4462_v59, 0.0 }
 0xdce   : > { %2817 = vadd.xlane.f32.xlu0 %v2816_v60  ;;  %v3196_v60 = vld [vmem:[%s4867_s10 + $0x20] sm:$0xff] }
 0xdd8   : > { %2821 = vrot.lane.b32.xlu1 %v2398_v47, %s4612_s6  ;;  %s5487_s6 = sld [smem:[#allocation36_spill]] }
 0xde2   : > { %v2490_v62 = vpop.xlane.xlu0 %2489 }
 0xde3   : > { %4463 = vrcp.f32 %v2490_v62  ;;  %v3197_v62 = vld [vmem:[%s4867_s10 + $0x28] sm:$0xff] }
 0xde4   : > { %2656 = vrot.lane.b32.xlu0 %v2398_v47, %s4611_s20  ;;  %4465 = vpow2.f32 %v2979_v2  ;;  %v4329_v63 = vpack.c.bf16 %v3197_v62, %v3196_v60  ;;  %v3199_v2 = vld [vmem:[%s4867_s10 + $0x38] sm:$0xff] }
 0xded   : > { %v4464_v3 = vpop.eup %4463 }
 0xdee   : > { %v2492_v4 = vmul.f32 %v4464_v3, %v4458_v48  ;;  %v4466_v6 = vpop.eup %4465  ;;  %v4333_v3 = vpack.c.bf16 %v3199_v2, %v3198_v1 }
 0xdef   : > { %v2981_v7 = vsel %vm1334_vm7, %v4466_v6, 0.0 }
 0xdf0   : > { %4170 = vmatmul.mubr.msk.f32.vlgmr.msra.gmra.mrb[18].mxu1 %vm1334_vm7, %v2492_v4  ;;  %v3305_v4 = vld [vmem:[%s4872_s2] sm:$0xff] }
 0xdf1   : > { %4179 = vmatprep.mubr.msk.f32.mxu1 %vm4609_vm6, %v4610_v32 }
 0xdfc   : > { %2982 = vadd.xlane.f32.xlu1 %v2981_v7 }
 0xe0d   : > { %2986 = vrot.lane.b32.xlu1 %v2398_v47, %s4613_s12  ;;  %s5488_s12 = scalar_lea.vmem %s5487_s6, %s4808_s1 }
 0xe0e   : > { %v3905_v43 = vld [vmem:[%s5488_s12] ss:$0 sm:$0xff] }
 0xe54   : > { %v2652_v8 = vpop.xlane.xlu1 %2651 }
 0xe55   : > { %4467 = vrcp.f32 %v2652_v8  ;;  %v3307_v8 = vld [vmem:[%s4872_s2 + $0x10] sm:$0xff] }
 0xe58   : > { %v2822_v12 = vpop.permute.xlu1 %2821 }
 0xe5b   : > { %v2818_v9 = vpop.xlane.xlu0 %2817 }
 0xe5c   : > { %4469 = vrcp.f32 %v2818_v9  ;;  %v3308_v9 = vld [vmem:[%s4872_s2 + $0x18] sm:$0xff] }
 0xe5f   : > { %v4468_v44 = vpop.eup %4467  ;;  %v2657_v10 = vpop.permute.xlu0 %2656 }
 0xe60   : > { %v2654_v11 = vmul.f32 %v4468_v44, %v4460_v57  ;;  %4178 = vmatpush3.msra.mxu1 %v2657_v10  ;;  %v4341_v44 = vpack.c.bf16 %v3308_v9, %v3307_v8 }
 0xe61   : > { %4187 = vmatprep.subr.mxu1 %v4610_v32 }
 0xe62   : > { %4180 = vmatmul.mubr.msk.f32.vlgmr.msra.gmra.mrb[20].mxu1 %vm1334_vm7, %v2654_v11 }
 0xe63   : > { %4188 = vmatpush3.msra.mxu1 %v2822_v12  ;;  %4189 = vmatprep.mubr.msk.f32.mxu1 %vm4609_vm6, %v4610_v32  ;;  %v3185_v12 = vrot.slane %v5110_v54, %v4961_v42 }
 0xe64   : > { %4197 = vmatprep.subr.mxu1 %v4610_v32 }
 0xe66   : > { %v4470_v13 = vpop.eup %4469 }
 0xe67   : > { %v2820_v14 = vmul.f32 %v4470_v13, %v4462_v59 }
 0xe69   : > { %4190 = vmatmul.mubr.msk.f32.vlgmr.msra.gmra.mrb[22].mxu1 %vm1334_vm7, %v2820_v14 }
 0xe6a   : > { %4199 = vmatprep.mubr.msk.f32.mxu1 %vm4609_vm6, %v4610_v32 }
 0xe89   : > { %v2983_v15 = vpop.xlane.xlu1 %2982 }
 0xe8a   : > { %4471 = vrcp.f32 %v2983_v15  ;;  %v3190_v15 = vrot.slane %v5117_v55, %v4961_v42  ;;  %v3921_v42 = vld [vmem:[%s924_s26] ss:$0 sm:$0xff] }
 0xe8d   : > { %v2987_v16 = vpop.permute.xlu1 %2986 }
 0xe8e   : > { %4198 = vmatpush3.msra.mxu1 %v2987_v16 }
 0xe8f   : > { %4320 = vmatprep.subr.bf16.mxu1 %v4608_v27 }
 0xe94   : > { %v4472_v17 = vpop.eup %4471 }
 0xe95   : > { %v2985_v18 = vmul.f32 %v4472_v17, %v4466_v6  ;;  %v3306_v6 = vld [vmem:[%s4872_s2 + $0x8] sm:$0xff] }
 0xe96   : > { %v4337_v7 = vpack.c.bf16 %v3306_v6, %v3305_v4 }
 0xe97   : > { %4200 = vmatmul.mubr.msk.f32.vlgmr.msra.gmra.mrb[24].mxu1 %vm1334_vm7, %v2985_v18 }
 0xe98   : > { %4229 = vmatprep.mubr.msk.f32.mxu1 %vm4609_vm6, %v4610_v32  ;;  %4323 = vmatpush3.bf16.xpose.msk.msra.mxu1 %vm4925_vm5, %v4321_v51 }
 0xe99   : > { %4324 = vmatprep.subr.bf16.mxu1 %v4608_v27 }
 0xec3   : > { %v2562_v19 = vpop.f32.mrb[18].mxu1 }
 0xec4   : > { %v4171_v20 = vpop.f32.mrb[19].mxu1 }
 0xf35   : > { %v2728_v26 = vpop.f32.mrb[20].mxu1 }
 0xf36   : > { %3063 = vrot.lane.b32.xlu0 %v2728_v26, %s4614_s22  ;;  %v4181_v29 = vpop.f32.mrb[21].mxu1  ;;  %s5489_s22 = sld [smem:[#allocation37_spill]] }
 0xf3c   : > { %v2893_v31 = vpop.f32.mrb[22].mxu1 }
 0xf3d   : > { %3067 = vrot.lane.b32.xlu1 %v2893_v31, %s4615_s13  ;;  %v4191_v33 = vpop.f32.mrb[23].mxu1  ;;  %s5490_s13 = scalar_lea.vmem %s5489_s22, %s4808_s1  ;;  %s5492_s1 = sld [smem:[#allocation13_spill]] }
 0xf3e   : > { %v3911_v17 = vld [vmem:[%s5490_s13] ss:$0 sm:$0xff] }
 0xf43   : > { %p3927_p1 = scmp.ne.s32.totalorder %s5492_s1, 1 }
 0xf44   : > { %s5493_s25 = sld [smem:[#allocation29_spill]] (!%p3927_p1)  ;;  %vm4618_vm12 = vmmov (!%p3927_p1), 0   ;;  %s5494_s3 = sld [smem:[#allocation30_spill]] (!%p3927_p1) }
 0xf6a   : > { %v3058_v34 = vpop.f32.mrb[24].mxu1 }
 0xf6b   : > { %3071 = vrot.lane.b32.xlu0 %v3058_v34, %s4616_s30  ;;  %v4201_v35 = vpop.f32.mrb[25].mxu1 }
 0xfa8   : > { %v3064_v36 = vpop.permute.xlu0 %3063 }
 0xfa9   : > { %v3074_v38 = vsel %vm1334_vm7, %v2562_v19, %v3064_v36 }
 0xfaf   : > { %v3068_v37 = vpop.permute.xlu1 %3067 }
 0xfb0   : > { %v3075_v39 = vsel %vm2004_vm8, %v3074_v38, %v3068_v37  ;;  %v3419_v38 = vrot.slane %v5110_v54, %v4999_v5  ;;  %v3432_v54 = vld [vmem:[%s5493_s25] sm:$0xff] (!%p3927_p1) }
 0xfdd   : > { %v3072_v40 = vpop.permute.xlu0 %3071 }
 0xfde   : > { %v3076_v41 = vsel %vm2006_vm9, %v3075_v39, %v3072_v40  ;;  %v3424_v40 = vrot.slane %v5117_v55, %v4999_v5  ;;  %v3928_v5 = vld [vmem:[%s5494_s3] ss:$0 sm:$0xff] (!%p3927_p1) }
 0xfdf   : > { %4211 = vmatmul.mubr.msk.f32.vlgmr.msra.gmra.mrb[20].mxu0 %vm1065_vm4, %v3076_v41 }
 0xfe0   : > { %4240 = vmatprep.mubr.msk.f32.mxu0 %vm4609_vm6, %v4610_v32  ;;  %v3194_v32 = vld [vmem:[%s4867_s10 + $0x10] sm:$0xff]  ;;  %4339 = vmatpush3.bf16.xpose.msk.msra.mxu0 %vm4338_vm11, %v4337_v7 }
 0xfe1   : > { %v4325_v53 = vpack.c.bf16 %v3195_v52, %v3194_v32  ;;  %4340 = vmatprep.subr.bf16.mxu0 %v4608_v27 }
 0xfe3   : > { %4327 = vmatpush3.bf16.xpose.msk.msra.mxu1 %vm4925_vm5, %v4325_v53 }
 0xfe4   : > { %4328 = vmatprep.subr.bf16.mxu1 %v4608_v27 }
 0xfe8   : > { %4343 = vmatpush3.bf16.xpose.msk.msra.mxu0 %vm4338_vm11, %v4341_v44 }
 0xfeb   : > { %4331 = vmatpush3.bf16.xpose.msk.msra.mxu1 %vm4925_vm5, %v4329_v63 }
 0xfec   : > { %4332 = vmatprep.subr.bf16.mxu1 %v4608_v27 }
 0xff3   : > { %4335 = vmatpush3.bf16.xpose.msk.msra.mxu1 %vm4925_vm5, %v4333_v3 }
0x10b2   : > { %v3164_v45 = vpop.f32.mrb[20].mxu0 }
0x10b3   : > { %v3165_v46 = vadd.f32 %v3905_v43, %v3164_v45  ;;  %v4212_v47 = vpop.f32.mrb[21].mxu0 }
0x10b5   : > { %v3168_v48 = vadd.f32 %v3165_v46, %v5123_v61  ;;  %v4617_v46 = vmov (!%p3927_p1), 0.0  }
0x10b6   : > { %4243 = vmatprep.subr.mxu0 (!%p3927_p1), %v4617_v46 }
0x10b7   : > { %v3169_v0 = vsel %vm1065_vm4, %v3168_v48, 0.0 }
0x10b8   : > { %3170 = vadd.xlane.f32.xlu1 %v3169_v0 }
0x1145   : > { %v3171_v61 = vpop.xlane.xlu1 %3170 }
0x1146   : > { %v3172_v56 = vmul.f32 0.03125, %v3171_v61 }
0x1148   : > { %v3173_v57 = vsub.f32 %v3168_v48, %v3172_v56 }
0x114a   : > { %v3174_v58 = vmul.f32 %v3173_v57, %v3173_v57 }
0x114c   : > { %v3175_v59 = vsel %vm1065_vm4, %v3174_v58, 0.0 }
0x114d   : > { %3176 = vadd.xlane.f32.xlu0 %v3175_v59 }
0x11da   : > { %v3177_v10 = vpop.xlane.xlu0 %3176 }
0x11db   : > { %v3178_v11 = vmul.f32 0.03125, %v3177_v10 }
0x11dd   : > { %v3179_v28 = vadd.f32 1e-05, %v3178_v11 }
0x11df   : > { %4473 = vrsqrt.f32 %v3179_v28 }
0x11e9   : > { %v4474_v13 = vpop.eup %4473 }
0x11ea   : > { %v3181_v14 = vmul.f32 %v4474_v13, %v3173_v57 }
0x11ec   : > { %v3186_v16 = vmul.f32 %v3185_v12, %v3181_v14 }
0x11ee   : > { %v3191_v27 = vadd.f32 %v3190_v15, %v3186_v16 }
0x11f0   : > { %4230 = vmatmul.mubr.msk.f32.vlgmr.msra.gmra.mrb[26].mxu1 %vm1065_vm4, %v3191_v27 }
0x12c3   : > { %v3300_v18 = vpop.f32.mrb[26].mxu1 }
0x12c4   : > { %v3301_v19 = vadd.f32 %v3911_v17, %v3300_v18  ;;  %v4231_v20 = vpop.f32.mrb[27].mxu1 }
0x12c6   : > { %v3304_v21 = vmax.f32 %v3301_v19, 0.0 }
0x12c8   : > { %4241 = vmatmul.mubr.msk.f32.vlgmr.msra.gmra.mrb[22].mxu0 %vm3316_vm10, %v3304_v21 }
0x12c9   : > { %4245 = vmatprep.mubr.msk.f32.mxu0 (!%p3927_p1), %vm4618_vm12, %v4617_v46  ;;  %4244 = vmatpush3.xpose.msk.msra.mxu0 (!%p3927_p1), %vm1065_vm4, %v3432_v54 }
0x139b   : > { %v3398_v22 = vpop.f32.mrb[22].mxu0 }
0x139c   : > { %v3399_v23 = vadd.f32 %v3921_v42, %v3398_v22  ;;  %v4242_v24 = vpop.f32.mrb[23].mxu0 }
0x139e   : > { %v3402_v25 = vadd.f32 %v3399_v23, %v3191_v27 }
0x13a0   : > { %v3403_v26 = vsel %vm1065_vm4, %v3402_v25, 0.0 }
0x13a1   : > { %3404 = vadd.xlane.f32.xlu0 %v3403_v26 }
0x142e   : > { %v3405_v29 = vpop.xlane.xlu0 %3404 }
0x142f   : > { %v3406_v30 = vmul.f32 0.03125, %v3405_v29 }
0x1431   : > { %v3407_v31 = vsub.f32 %v3402_v25, %v3406_v30 }
0x1433   : > { %v3408_v33 = vmul.f32 %v3407_v31, %v3407_v31 }
0x1435   : > { %v3409_v34 = vsel %vm1065_vm4, %v3408_v33, 0.0 }
0x1436   : > { %3410 = vadd.xlane.f32.xlu1 %v3409_v34 }
0x14c3   : > { %v3411_v35 = vpop.xlane.xlu1 %3410 }
0x14c4   : > { %v3412_v36 = vmul.f32 0.03125, %v3411_v35 }
0x14c6   : > { %v3413_v37 = vadd.f32 1e-05, %v3412_v36 }
0x14c8   : > { %4475 = vrsqrt.f32 %v3413_v37 }
0x14d2   : > { %v4476_v39 = vpop.eup %4475 }
0x14d3   : > { %v3415_v41 = vmul.f32 %v4476_v39, %v3407_v31  ;;  %3430 = sbr.rel (%p3927_p1) target bundleno = 5552 (0x15b0), region = 108 }
0x14d5   : > { %v3420_v43 = vmul.f32 %v3419_v38, %v3415_v41 }
0x14d7   : > { %v3425_v45 = vadd.f32 %v3424_v40, %v3420_v43 }
0x14d9   : > { %3426 = vst.msk [vmem:[#allocation2] sm:$0xff] %vm1065_vm4, %v3425_v45  ;;  %3431 = vst.msk [vmem:[%s4886_s18] sm:$0xff] (!%p3927_p1), %vm1065_vm4, %v3425_v45  ;;  %4246 = vmatmul.mubr.msk.f32.vlgmr.msra.gmra.mrb[0].mxu0 (!%p3927_p1), %vm1065_vm4, %v3425_v45 }
0x15ac   : > { %v3512_v55 = vpop.f32.mrb[0].mxu0 }
0x15ad   : > { %v3513_v47 = vadd.f32 %v3928_v5, %v3512_v55  ;;  %v4247_v48 = vpop.f32.mrb[1].mxu0 }
0x15af   : > { %3516 = vst.msk [vmem:[%s4888_s24] sm:$0xff] %vm1334_vm7, %v3513_v47 }
0x15b0 PF: > { %s5495_s29 = sld [smem:[#allocation14_spill]]  ;;  %s5496_s0 = sld [smem:[#allocation23_spill]] }
0x15b1   : > { %s5498_s16 = sld [smem:[#allocation42_spill]]  ;;  %s3536_s20 = sshll.u32 %s4886_s18, 4  ;;  %s3537_s20 = int_to_ptr.vmem [resolvable:$true] %s3536_s20 }
0x15b2   : > { %s4477_s12 = scalar_lea.vmem %s3537_s20, 128  ;;  %s4619_s10 = smov [#allocation4]  }
0x15b3   : > { %p4478_p2 = scmp.ne.s32.totalorder %s3537_s20, %s4477_s12  ;;  %s4481_s2 = sshll.u32 %s4619_s10, 4  ;;  %s4482_s2 = int_to_ptr.vmem [resolvable:$false] %s4481_s2 }
0x15b4   : > { %s4483_s22 = scalar_lea.vmem %s4482_s2, 256  ;;  %p4484_p6 = scmp.lt.s32.totalorder %s3537_s20, %s4482_s2 }
0x15b5   : > { %p4479_p4 = pnand %p4478_p2, %p4780_p3  ;;  %p4485_p7 = scmp.lt.s32.totalorder %s4483_s22, %s4477_s12 }
0x15b6   : > { %s3933_s15 = sshll.u32 %s5495_s29, 7  ;;  %s3518_s6 = scalar_lea.sflag [#allocation5], %s5496_s0 }
0x15b7   : > { %s5307_s23 = scalar_lea.hbm %s5498_s16, %s3933_s15  ;;  %p4480_p5 = pneg %p4479_p4 }
0x15b8   : > { %p4486_p8 = por %p4485_p7, %p4484_p6 }
0x15ba   : > { %p4487_p10 = pnand %p4486_p8, %p4480_p5 }
0x15bc   : > { %4490 = shalt.err (!%p4487_p10)
}
0x15bd   : > { %s4491_s18 = scalar_lea.hbm %s5307_s23, 128  ;;  %s4495_s5 = scalar_lea.hbm %s5498_s16, 256 }
0x15be   : > { %p4492_p11 = scmp.ne.s32.totalorder %s5307_s23, %s4491_s18  ;;  %p4496_p0 = scmp.lt.u32.totalorder %s5307_s23, %s5498_s16 }
0x15bf   : > { %p4497_p1 = scmp.lt.u32.totalorder %s4495_s5, %s4491_s18  ;;  %p4499_p4 = scmp.lt.u32.totalorder %s4491_s18, %s5307_s23 }
0x15c0   : > { %p4493_p12 = pnand %p4492_p11, %p4780_p3 }
0x15c1   : > { %p4498_p2 = por %p4497_p1, %p4496_p0 }
0x15c2   : > { %p4494_p13 = pneg %p4493_p12 }
0x15c3   : > { %p4500_p5 = por %p4499_p4, %p4498_p2 }
0x15c5   : > { %p4501_p6 = pnand %p4500_p5, %p4494_p13 }
0x15c7   : > { %4504 = shalt.err (!%p4501_p6)
}
0x15c8   : > { %4345 = dma.vmem_to_hbm [thread:$0]  (%p4780_p3), %s3537_s20, 128, %s5307_s23, %s3518_s6  }
0x15c9   : > { %s5499_s25 = sld [smem:[#allocation43_spill]]  ;;  %s3549_s3 = sshll.u32 %s4888_s24, 4  ;;  %s3550_s3 = int_to_ptr.vmem [resolvable:$true] %s3549_s3 }
0x15ca   : > { %s3523_s19 = scalar_lea.sflag [#allocation7], %s5496_s0  ;;  %s4505_s4 = scalar_lea.vmem %s3550_s3, 128 }
0x15cb   : > { %p4506_p7 = scmp.ne.s32.totalorder %s3550_s3, %s4505_s4  ;;  %s4620_s12 = smov [#allocation6]  }
0x15cc   : > { %s4509_s10 = sshll.u32 %s4620_s12, 4  ;;  %s4510_s10 = int_to_ptr.vmem [resolvable:$false] %s4509_s10 }
0x15cd   : > { %p4507_p8 = pnand %p4506_p7, %p4780_p3  ;;  %s4511_s2 = scalar_lea.vmem %s4510_s10, 256 }
0x15ce   : > { %p4512_p11 = scmp.lt.s32.totalorder %s3550_s3, %s4510_s10  ;;  %p4513_p12 = scmp.lt.s32.totalorder %s4511_s2, %s4505_s4 }
0x15cf   : > { %s5500_s17 = smov %s5499_s25  ;;  %s5333_s27 = scalar_lea.hbm %s5499_s25, %s3933_s15 }
0x15d0   : > { %p4508_p10 = pneg %p4507_p8  ;;  %p4514_p13 = por %p4513_p12, %p4512_p11 }
0x15d2   : > { %p4515_p0 = pnand %p4514_p13, %p4508_p10 }
0x15d4   : > { %4518 = shalt.err (!%p4515_p0)
}
0x15d5   : > { %s4519_s24 = scalar_lea.hbm %s5333_s27, 128  ;;  %s4523_s15 = scalar_lea.hbm %s5500_s17, 256 }
0x15d6   : > { %p4520_p1 = scmp.ne.s32.totalorder %s5333_s27, %s4519_s24  ;;  %p4524_p5 = scmp.lt.u32.totalorder %s5333_s27, %s5500_s17 }
0x15d7   : > { %p4525_p6 = scmp.lt.u32.totalorder %s4523_s15, %s4519_s24  ;;  %p4527_p8 = scmp.lt.u32.totalorder %s4519_s24, %s5333_s27 }
0x15d8   : > { %p4521_p2 = pnand %p4520_p1, %p4780_p3 }
0x15d9   : > { %p4526_p7 = por %p4525_p6, %p4524_p5 }
0x15da   : > { %p4522_p4 = pneg %p4521_p2 }
0x15db   : > { %p4528_p10 = por %p4527_p8, %p4526_p7 }
0x15dd   : > { %p4529_p11 = pnand %p4528_p10, %p4522_p4 }
0x15df   : > { %4532 = shalt.err (!%p4529_p11)
}
0x15e0   : > { %4346 = dma.vmem_to_hbm [thread:$0]  (%p4780_p3), %s3550_s3, 128, %s5333_s27, %s3523_s19  }
0x15e1 PF: > { %s5501_s6 = sld [smem:[#allocation17_spill]]  ;;  %s5502_s22 = sld [smem:[#allocation10_spill]] }
0x15e7   : > { %p4356_p12 = scmp.ge.s32.totalorder %s5501_s6, 2  ;;  %s3561_s13 = sand.u32 1, %s5502_s22  }
0x15e8   : > { %s3562_s30 = scalar_lea.sflag [#allocation5], %s3561_s13 }
0x15e9   : > { %p4350_p13 = pnand %p4356_p12, %p4790_p9 }
0x15eb   : > { %4566 = dma.done.wait (!%p4350_p13), %s3562_s30, 128  }
0x15ec   : > { %4568 = vsyncadd (!%p4350_p13), %s3562_s30, 4294967168  ;;  %s3571_s5 = scalar_lea.sflag [#allocation7], %s3561_s13 }
0x15ed   : > { %4570 = dma.done.wait (!%p4350_p13), %s3571_s5, 128  }
0x15ee   : > { %4572 = vsyncadd (!%p4350_p13), %s3571_s5, 4294967168  ;;  %s38_s0 = sadd.s32 1, %s5501_s6   ;;  %s5504_s2 = sld [smem:[#allocation11_spill]] }
0x15ef   : > { %p35_p0 = scmp.ge.s32.totalorder %s38_s0, 6   ;;  %s5505_s25 = sld [smem:[#allocation12_spill]] }
0x15f0   : > { %s5506_s26 = sld [smem:[#allocation22_spill]]  ;;  %s5507_s27 = sld [smem:[#allocation15_spill]] }
0x15f1   : > { %s5508_s3 = sld [smem:[#allocation16_spill]]  ;;  %s5509_s28 = sld [smem:[#allocation18_spill]] }
0x15f2   : > { %s5510_s29 = sld [smem:[#allocation20_spill]]  ;;  %37 = sbr.rel (!%p35_p0) target bundleno = 27 (0x1b), region = 205 }
0x15f9   :  { %3576 = vsyncpa [#allocation5], 1 }
0x15fa   :  { %3578 = vsyncpa [#allocation5 + $0x1], 1 }
0x15fb   :  { %3579 = vsyncpa [#allocation7], 1 }
0x15fc   :  { %3581 = vsyncpa [#allocation7 + $0x1], 1 }

</bundles_post_ra>
